<compile_context>
chip_gen: v5e
topology: v5e:2x2
jax: 0.10.0
libtpu: 0.0.40
codegen_flags: <defaults>
</compile_context>

<pallas_src>
import functools
import math

import jax
import jax.numpy as jnp
from jax.experimental import pallas as pl
from jax.experimental.pallas import tpu as pltpu


# ----------------------------- config (small) -----------------------------
DIM = 64            # config.dim
N_HEAD = 4          # config.n_head
N_KV_HEAD = 2       # config.n_kv_head (GQA)
HEAD_DIM = DIM // N_HEAD
KV_SIZE = N_KV_HEAD * HEAD_DIM
TOTAL_KV_DIM = (N_HEAD + 2 * N_KV_HEAD) * HEAD_DIM      # 128
MULTIPLE_OF = 64
NORM_EPS = 1e-5
ROPE_BASE = 10000
BATCH = 2
SEQ = 8


def find_multiple(n: int, k: int) -> int:
    if n % k == 0:
        return n
    return n + k - n % k


HIDDEN_DIM = find_multiple(int(2 * (4 * DIM) / 3), MULTIPLE_OF)   # 192
HIDDEN_PAD = find_multiple(HIDDEN_DIM, 128)                       # 256
# fused first-stage width: q | k_rep | v_rep | q_swap | k_rep_swap  (5*D=320)
QKV_EXT = find_multiple(5 * DIM, 128)                             # 384


# ------------------------------- the kernel -------------------------------
def _transformer_block_kernel(
    x_ref,       # (bs, D)          f32
    rope_ref,    # (bs, 2*D)        f32   [cos | sin], lane-dense
    wa_ref,      # (D, QKV_EXT + 2*HID_PAD) bf16
    wb_ref,      # (HID_PAD, 2*D)   bf16  [wo (top-left) | w2 (right half)]
    o_ref,       # (bs, D)          f32
    *,
    batch: int,
    seq: int,
    dim: int,
    n_head: int,
    head_dim: int,
    hid_pad: int,
    qkv_w: int,
    eps: float,
):
    bs = batch * seq
    ncol = n_head * bs

    x = x_ref[...]                                               # (bs, D) f32

    # ---- attention RMSNorm (gain + score scale pre-folded into wa rows) ----
    h = x * jax.lax.rsqrt(jnp.mean(x * x, axis=-1, keepdims=True) + eps)

    # ---- one fused projection: q | k(expanded) | v(expanded) | q_sw | k_sw ----
    qkv = jnp.dot(h.astype(jnp.bfloat16), wa_ref[:, :qkv_w],
                  preferred_element_type=jnp.float32)            # (bs, qkv_w)
    q    = qkv[:, 0 * dim:1 * dim]
    k    = qkv[:, 1 * dim:2 * dim]
    v    = qkv[:, 2 * dim:3 * dim]
    q_sw = qkv[:, 3 * dim:4 * dim]                               # h @ (Wq^T @ A)
    k_sw = qkv[:, 4 * dim:5 * dim]                               # h @ (Wk_rep^T @ A)

    # ---- rotary embedding: x*cos + pair_swap(x)*sin (swap folded in weights) ----
    cos = rope_ref[:, :dim]
    sin = rope_ref[:, dim:]
    q = q * cos + q_sw * sin
    k = k * cos + k_sw * sin

    # ---- all heads & both batches in two MXU matmuls (block-diagonal K / V) ----
    rr = jax.lax.broadcasted_iota(jnp.int32, (ncol, dim), 0)
    cc = jax.lax.broadcasted_iota(jnp.int32, (ncol, dim), 1)
    blk = None
    for hh in range(n_head):        # per-head diagonal block mask (no int div)
        t = ((rr >= hh * bs) & (rr < (hh + 1) * bs) &
             (cc >= hh * head_dim) & (cc < (hh + 1) * head_dim))
        blk = t if blk is None else jnp.logical_or(blk, t)

    k_full = jnp.concatenate([k] * n_head, axis=0)               # (ncol, dim)
    v_full = jnp.concatenate([v] * n_head, axis=0)
    kbd = jnp.where(blk, k_full, 0.0).astype(jnp.bfloat16)       # block-diag K
    vbd = jnp.where(blk, v_full, 0.0).astype(jnp.bfloat16)       # block-diag V

    # scores for every (head, key) column at once: (bs, n_head*bs)
    s = jnp.einsum('rd,cd->rc', q.astype(jnp.bfloat16), kbd,
                   preferred_element_type=jnp.float32)

    # causal & same-batch mask (bs, bs), reused by every head block
    qr = jax.lax.broadcasted_iota(jnp.int32, (bs, bs), 0)
    kc = jax.lax.broadcasted_iota(jnp.int32, (bs, bs), 1)
    sameb = None
    for b in range(batch):
        t = ((qr >= b * seq) & (qr < (b + 1) * seq) &
             (kc >= b * seq) & (kc < (b + 1) * seq))
        sameb = t if sameb is None else jnp.logical_or(sameb, t)
    valid = jnp.logical_and(sameb, kc <= qr)

    # grouped softmax (one group of bs lanes per head)
    pieces = []
    for hh in range(n_head):
        sh = jnp.where(valid, s[:, hh * bs:(hh + 1) * bs], -1e30)
        mh = jnp.max(sh, axis=-1, keepdims=True)
        eh = jnp.exp(sh - mh)
        inv = pl.reciprocal(jnp.sum(eh, axis=-1, keepdims=True), approx=True)
        pieces.append(eh * inv)
    p = jnp.concatenate(pieces, axis=1).astype(jnp.bfloat16)     # (bs, ncol)

    attn = jnp.dot(p, vbd, preferred_element_type=jnp.float32)   # (bs, D)

    attn_out = jnp.dot(attn.astype(jnp.bfloat16), wb_ref[:dim, :dim],
                       preferred_element_type=jnp.float32)       # @ wo^T

    # TODO(synk): resid/ffn Dropout and DropPath(0.0) are identities in eval mode.
    h1 = x + attn_out

    # ---- FFN RMSNorm (gain folded into w13 rows) + SwiGLU, fused w1|w3 ----
    f = h1 * jax.lax.rsqrt(jnp.mean(h1 * h1, axis=-1, keepdims=True) + eps)
    a13 = jnp.dot(f.astype(jnp.bfloat16), wa_ref[:, qkv_w:],
                  preferred_element_type=jnp.float32)            # (bs, 2*hid_pad)
    a1 = a13[:, :hid_pad]
    a3 = a13[:, hid_pad:]
    gated = a1 * jax.nn.sigmoid(a1) * a3                         # silu(a1)*a3
    ffn = jnp.dot(gated.astype(jnp.bfloat16), wb_ref[:, dim:],
                  preferred_element_type=jnp.float32)            # @ w2^T

    o_ref[...] = (h1 + ffn).astype(o_ref.dtype)


# ------------------------------- the wrapper -------------------------------
def _pairswap_matrix(n):
    # (x@A)[2j] = -x[2j+1], (x@A)[2j+1] = x[2j]   (per-pair, head-local)
    idx = jnp.arange(n)
    A = jnp.zeros((n, n), jnp.float32)
    A = A.at[idx[1::2], idx[0::2]].set(-1.0)
    A = A.at[idx[0::2], idx[1::2]].set(1.0)
    return A


def transformer_block_pallas(x, freqs_cis, params):
    """x: (B, S, D) f32; freqs_cis: (S, head_dim//2, 2) [cos, sin]."""
    B, S, D = x.shape
    assert D == DIM
    bs = B * S
    rep = N_HEAD // N_KV_HEAD
    hd = HEAD_DIM
    kv = KV_SIZE

    anw = params["attention_norm_w"].astype(jnp.float32)
    fnw = params["ffn_norm_w"].astype(jnp.float32)

    # --- one lane-dense RoPE table: [cos | sin], (bs, 2*D) ---
    cos = freqs_cis[..., 0]                                   # (S, hd/2)
    sin = freqs_cis[..., 1]
    cos_i = jnp.repeat(cos, 2, axis=-1)                       # (S, hd)
    sin_i = jnp.repeat(sin, 2, axis=-1)
    cos_q = jnp.tile(cos_i, (B, N_HEAD))                      # (bs, D)
    sin_q = jnp.tile(sin_i, (B, N_HEAD))
    rope_tab = jnp.concatenate([cos_q, sin_q], axis=1)        # (bs, 2*D)

    # --- fused first-stage weight (attn-norm gain + 1/sqrt(hd) folded in) ---
    wqkv_t = params["wqkv"].T * anw[:, None]                  # (D, TOT) f32
    wq = wqkv_t[:, :D] * (1.0 / math.sqrt(hd))                # exact *0.25 in bf16
    wk = wqkv_t[:, D:D + kv]
    wv = wqkv_t[:, D + kv:D + 2 * kv]
    # GQA expansion host-side (MXU is idle; removes all in-kernel head repeats)
    wk_rep = jnp.concatenate(
        [wk[:, g * hd:(g + 1) * hd] for g in range(N_KV_HEAD) for _ in range(rep)], axis=1)
    wv_rep = jnp.concatenate(
        [wv[:, g * hd:(g + 1) * hd] for g in range(N_KV_HEAD) for _ in range(rep)], axis=1)
    A = _pairswap_matrix(D)
    wq_sw = wq @ A
    wk_sw = wk_rep @ A
    wqkv_ext = jnp.concatenate([wq, wk_rep, wv_rep, wq_sw, wk_sw], axis=1)   # (D, 5D)
    wqkv_ext = jnp.pad(wqkv_ext, ((0, 0), (0, QKV_EXT - wqkv_ext.shape[1])))

    # ffn-norm gain folded into w1/w3 rows; hidden zero-padded to 128 lanes
    w1_t = params["w1"].T * fnw[:, None]
    w3_t = params["w3"].T * fnw[:, None]
    pad_h = HIDDEN_PAD - HIDDEN_DIM
    w13 = jnp.concatenate([jnp.pad(w1_t, ((0, 0), (0, pad_h))),
                           jnp.pad(w3_t, ((0, 0), (0, pad_h)))], axis=1)     # (D, 2*HID_PAD)
    wa = jnp.concatenate([wqkv_ext, w13], axis=1).astype(jnp.bfloat16)       # (D, 896)

    # --- fused second-stage weight: wo in [0:D, 0:D], w2 in [:, D:2D] ---
    wo_t = params["wo"].T                                     # (D, D)
    w2_t = jnp.pad(params["w2"].T, ((0, pad_h), (0, 0)))      # (HID_PAD, D)
    wb = jnp.zeros((HIDDEN_PAD, 2 * D), jnp.float32)
    wb = wb.at[:D, :D].set(wo_t)
    wb = wb.at[:, D:].set(w2_t)
    wb = wb.astype(jnp.bfloat16)                              # (HID_PAD, 2*D)

    x2 = x.reshape(bs, D)

    kernel = functools.partial(
        _transformer_block_kernel,
        batch=B, seq=S, dim=D, n_head=N_HEAD, head_dim=hd,
        hid_pad=HIDDEN_PAD, qkv_w=QKV_EXT, eps=NORM_EPS)

    out2 = pl.pallas_call(
        kernel,
        out_shape=jax.ShapeDtypeStruct((bs, D), x.dtype),
        grid_spec=pltpu.PrefetchScalarGridSpec(
            num_scalar_prefetch=0,
            grid=(1,),                       # whole batch folded into one step
            in_specs=[
                pl.BlockSpec((bs, D), lambda i: (0, 0)),          # x
                pl.BlockSpec((bs, 2 * D), lambda i: (0, 0)),      # rope [cos|sin]
                pl.BlockSpec(wa.shape, lambda i: (0, 0)),         # fused qkv|w1|w3
                pl.BlockSpec(wb.shape, lambda i: (0, 0)),         # fused wo|w2
            ],
            out_specs=pl.BlockSpec((bs, D), lambda i: (0, 0)),
        ),
        compiler_params=pltpu.CompilerParams(
            dimension_semantics=("arbitrary",)),
    )(x2, rope_tab, wa, wb)
    return out2.reshape(B, S, D)


# --------------------------- pure-JAX reference ----------------------------
def transformer_block_ref(x, freqs_cis, params):
    B, S, D = x.shape

    def rms(v, w):
        vf = v.astype(jnp.float32)
        return vf * jax.lax.rsqrt(
            jnp.mean(vf * vf, axis=-1, keepdims=True) + NORM_EPS) * w

    def rope(v):  # v: (B, S, H, hd)
        H = v.shape[2]
        vs = v.reshape(B, S, H, HEAD_DIM // 2, 2)
        fc = freqs_cis.reshape(1, S, 1, HEAD_DIM // 2, 2)
        r0 = vs[..., 0] * fc[..., 0] - vs[..., 1] * fc[..., 1]
        r1 = vs[..., 1] * fc[..., 0] + vs[..., 0] * fc[..., 1]
        return jnp.stack([r0, r1], axis=-1).reshape(B, S, H, HEAD_DIM)

    h = rms(x, params["attention_norm_w"])
    qkv = h @ params["wqkv"].T
    xq = qkv[..., :D].reshape(B, S, N_HEAD, HEAD_DIM)
    xk = qkv[..., D:D + KV_SIZE].reshape(B, S, N_KV_HEAD, HEAD_DIM)
    xv = qkv[..., D + KV_SIZE:].reshape(B, S, N_KV_HEAD, HEAD_DIM)
    xq, xk = rope(xq), rope(xk)
    xq = xq.transpose(0, 2, 1, 3)
    xk = xk.transpose(0, 2, 1, 3)
    xv = xv.transpose(0, 2, 1, 3)
    rep = N_HEAD // N_KV_HEAD
    keys = jnp.repeat(xk, rep, axis=1)
    values = jnp.repeat(xv, rep, axis=1)
    scores = (xq @ keys.transpose(0, 1, 3, 2)) / math.sqrt(HEAD_DIM)
    causal = jnp.tril(jnp.ones((S, S), bool))
    scores = jnp.where(causal[None, None], scores, -jnp.inf)
    probs = jax.nn.softmax(scores, axis=-1)
    out = (probs @ values).transpose(0, 2, 1, 3).reshape(B, S, D)
    h1 = x + out @ params["wo"].T

    f = rms(h1, params["ffn_norm_w"])
    a1 = f @ params["w1"].T
    a3 = f @ params["w3"].T
    ffn = (jax.nn.silu(a1) * a3) @ params["w2"].T
    return h1 + ffn


# ---------------------------------- main ----------------------------------
if __name__ == "__main__":
    key = jax.random.PRNGKey(0)
    ks = jax.random.split(key, 10)
    init = 0.02

    params = {
        "wqkv": jax.random.normal(ks[0], (TOTAL_KV_DIM, DIM), jnp.float32) * init,
        "wo": jax.random.normal(ks[1], (DIM, DIM), jnp.float32) * init,
        "w1": jax.random.normal(ks[2], (HIDDEN_DIM, DIM), jnp.float32) * init,
        "w3": jax.random.normal(ks[3], (HIDDEN_DIM, DIM), jnp.float32) * init,
        "w2": jax.random.normal(ks[4], (DIM, HIDDEN_DIM), jnp.float32) * init,
        # non-unit gains so the norm-folding path is actually exercised
        "attention_norm_w": 1.0 + 0.1 * jax.random.normal(ks[6], (DIM,), jnp.float32),
        "ffn_norm_w": 1.0 + 0.1 * jax.random.normal(ks[7], (DIM,), jnp.float32),
    }

    x = jax.random.normal(ks[5], (BATCH, SEQ, DIM), jnp.float32)

    # precompute_freqs_cis-style rotary table: (S, head_dim//2, 2) = [cos, sin]
    inv_freq = 1.0 / (ROPE_BASE ** (jnp.arange(0, HEAD_DIM, 2, dtype=jnp.float32) / HEAD_DIM))
    t = jnp.arange(SEQ, dtype=jnp.float32)
    angles = jnp.outer(t, inv_freq)                       # (S, hd/2)
    freqs_cis = jnp.stack([jnp.cos(angles), jnp.sin(angles)], axis=-1)

    out = transformer_block_pallas(x, freqs_cis, params)
    out = jax.block_until_ready(out)

    ref = transformer_block_ref(x, freqs_cis, params)
    assert out.shape == (BATCH, SEQ, DIM)
    assert jnp.allclose(out, ref, atol=1e-3, rtol=1e-3), (
        f"max abs err {jnp.max(jnp.abs(out - ref))}")

    print("KERNEL_OK")
</pallas_src>

<mosaic_0001>
module attributes {stable_mosaic.version = 11 : i64} {
  func.func @_transformer_block_kernel(%arg0: i32, %arg1: memref<16x64xf32, #tpu.memory_space<vmem>>, %arg2: memref<16x128xf32, #tpu.memory_space<vmem>>, %arg3: memref<64x896xbf16, #tpu.memory_space<vmem>>, %arg4: memref<256x128xbf16, #tpu.memory_space<vmem>>, %arg5: memref<16x64xf32, #tpu.memory_space<vmem>>) attributes {dimension_semantics = [#tpu.dimension_semantics<arbitrary>], iteration_bounds = array<i64: 1>, scalar_prefetch = 0 : i64, scratch_operands = 0 : i64, tpu.core_type = #tpu.core_type<tc>, window_params = [{pipeline_mode = #tpu.pipeline_mode<synchronous>, transform_indices = @transform_0, window_bounds = array<i64: 16, 64>}, {pipeline_mode = #tpu.pipeline_mode<synchronous>, transform_indices = @transform_1, window_bounds = array<i64: 16, 128>}, {pipeline_mode = #tpu.pipeline_mode<synchronous>, transform_indices = @transform_2, window_bounds = array<i64: 64, 896>}, {pipeline_mode = #tpu.pipeline_mode<synchronous>, transform_indices = @transform_3, window_bounds = array<i64: 256, 128>}, {pipeline_mode = #tpu.pipeline_mode<synchronous>, transform_indices = @transform_4, window_bounds = array<i64: 16, 64>}]} {
    %c0 = arith.constant 0 : index
    %c0_0 = arith.constant 0 : index
    %0 = vector.load %arg1[%c0, %c0_0] : memref<16x64xf32, #tpu.memory_space<vmem>>, vector<16x64xf32>
    %1 = arith.mulf %0, %0 : vector<16x64xf32>
    %cst = arith.constant dense<0.000000e+00> : vector<16xf32>
    %2 = vector.multi_reduction <add>, %1, %cst [1] : vector<16x64xf32> to vector<16xf32>
    %3 = vector.shape_cast %2 : vector<16xf32> to vector<16x1xf32>
    %cst_1 = arith.constant 6.400000e+01 : f32
    %4 = vector.broadcast %cst_1 : f32 to vector<16x1xf32>
    %5 = arith.divf %3, %4 : vector<16x1xf32>
    %cst_2 = arith.constant 9.99999974E-6 : f32
    %6 = vector.broadcast %cst_2 : f32 to vector<16x1xf32>
    %7 = arith.addf %5, %6 : vector<16x1xf32>
    %8 = math.rsqrt %7 : vector<16x1xf32>
    %9 = vector.broadcast %8 : vector<16x1xf32> to vector<16x64xf32>
    %10 = arith.mulf %0, %9 : vector<16x64xf32>
    %11 = arith.truncf %10 : vector<16x64xf32> to vector<16x64xbf16>
    %c0_3 = arith.constant 0 : index
    %c0_4 = arith.constant 0 : index
    %12 = vector.load %arg3[%c0_3, %c0_4] : memref<64x896xbf16, #tpu.memory_space<vmem>>, vector<64x384xbf16>
    %cst_5 = arith.constant dense<0.000000e+00> : vector<16x384xf32>
    %13 = tpu.matmul %11, %12, %cst_5 {dimension_numbers = #tpu.dot_dimension_numbers<[1], [0], [0], [1], [0, 0, 1, 1], [], []>} : vector<16x64xbf16>, vector<64x384xbf16>, vector<16x384xf32> -> vector<16x384xf32>
    %14 = vector.extract_strided_slice %13 {offsets = [0, 0], sizes = [16, 64], strides = [1, 1]} : vector<16x384xf32> to vector<16x64xf32>
    %15 = vector.extract_strided_slice %13 {offsets = [0, 64], sizes = [16, 64], strides = [1, 1]} : vector<16x384xf32> to vector<16x64xf32>
    %16 = vector.extract_strided_slice %13 {offsets = [0, 128], sizes = [16, 64], strides = [1, 1]} : vector<16x384xf32> to vector<16x64xf32>
    %17 = vector.extract_strided_slice %13 {offsets = [0, 192], sizes = [16, 64], strides = [1, 1]} : vector<16x384xf32> to vector<16x64xf32>
    %18 = vector.extract_strided_slice %13 {offsets = [0, 256], sizes = [16, 64], strides = [1, 1]} : vector<16x384xf32> to vector<16x64xf32>
    %c0_6 = arith.constant 0 : index
    %c0_7 = arith.constant 0 : index
    %19 = vector.load %arg2[%c0_6, %c0_7] : memref<16x128xf32, #tpu.memory_space<vmem>>, vector<16x64xf32>
    %c0_8 = arith.constant 0 : index
    %c64 = arith.constant 64 : index
    %20 = vector.load %arg2[%c0_8, %c64] : memref<16x128xf32, #tpu.memory_space<vmem>>, vector<16x64xf32>
    %21 = arith.mulf %14, %19 : vector<16x64xf32>
    %22 = arith.mulf %17, %20 : vector<16x64xf32>
    %23 = arith.addf %21, %22 : vector<16x64xf32>
    %24 = arith.mulf %15, %19 : vector<16x64xf32>
    %25 = arith.mulf %18, %20 : vector<16x64xf32>
    %26 = arith.addf %24, %25 : vector<16x64xf32>
    %27 = tpu.iota {dimensions = array<i32: 0>} : vector<64x64xi32>
    %28 = tpu.iota {dimensions = array<i32: 1>} : vector<64x64xi32>
    %c0_i32 = arith.constant 0 : i32
    %29 = vector.broadcast %c0_i32 : i32 to vector<64x64xi32>
    %30 = arith.cmpi sge, %27, %29 : vector<64x64xi32>
    %c16_i32 = arith.constant 16 : i32
    %31 = vector.broadcast %c16_i32 : i32 to vector<64x64xi32>
    %32 = arith.cmpi slt, %27, %31 : vector<64x64xi32>
    %33 = arith.andi %30, %32 : vector<64x64xi1>
    %c0_i32_9 = arith.constant 0 : i32
    %34 = vector.broadcast %c0_i32_9 : i32 to vector<64x64xi32>
    %35 = arith.cmpi sge, %28, %34 : vector<64x64xi32>
    %36 = arith.andi %33, %35 : vector<64x64xi1>
    %c16_i32_10 = arith.constant 16 : i32
    %37 = vector.broadcast %c16_i32_10 : i32 to vector<64x64xi32>
    %38 = arith.cmpi slt, %28, %37 : vector<64x64xi32>
    %39 = arith.andi %36, %38 : vector<64x64xi1>
    %c16_i32_11 = arith.constant 16 : i32
    %40 = vector.broadcast %c16_i32_11 : i32 to vector<64x64xi32>
    %41 = arith.cmpi sge, %27, %40 : vector<64x64xi32>
    %c32_i32 = arith.constant 32 : i32
    %42 = vector.broadcast %c32_i32 : i32 to vector<64x64xi32>
    %43 = arith.cmpi slt, %27, %42 : vector<64x64xi32>
    %44 = arith.andi %41, %43 : vector<64x64xi1>
    %c16_i32_12 = arith.constant 16 : i32
    %45 = vector.broadcast %c16_i32_12 : i32 to vector<64x64xi32>
    %46 = arith.cmpi sge, %28, %45 : vector<64x64xi32>
    %47 = arith.andi %44, %46 : vector<64x64xi1>
    %c32_i32_13 = arith.constant 32 : i32
    %48 = vector.broadcast %c32_i32_13 : i32 to vector<64x64xi32>
    %49 = arith.cmpi slt, %28, %48 : vector<64x64xi32>
    %50 = arith.andi %47, %49 : vector<64x64xi1>
    %51 = arith.ori %39, %50 : vector<64x64xi1>
    %c32_i32_14 = arith.constant 32 : i32
    %52 = vector.broadcast %c32_i32_14 : i32 to vector<64x64xi32>
    %53 = arith.cmpi sge, %27, %52 : vector<64x64xi32>
    %c48_i32 = arith.constant 48 : i32
    %54 = vector.broadcast %c48_i32 : i32 to vector<64x64xi32>
    %55 = arith.cmpi slt, %27, %54 : vector<64x64xi32>
    %56 = arith.andi %53, %55 : vector<64x64xi1>
    %c32_i32_15 = arith.constant 32 : i32
    %57 = vector.broadcast %c32_i32_15 : i32 to vector<64x64xi32>
    %58 = arith.cmpi sge, %28, %57 : vector<64x64xi32>
    %59 = arith.andi %56, %58 : vector<64x64xi1>
    %c48_i32_16 = arith.constant 48 : i32
    %60 = vector.broadcast %c48_i32_16 : i32 to vector<64x64xi32>
    %61 = arith.cmpi slt, %28, %60 : vector<64x64xi32>
    %62 = arith.andi %59, %61 : vector<64x64xi1>
    %63 = arith.ori %51, %62 : vector<64x64xi1>
    %c48_i32_17 = arith.constant 48 : i32
    %64 = vector.broadcast %c48_i32_17 : i32 to vector<64x64xi32>
    %65 = arith.cmpi sge, %27, %64 : vector<64x64xi32>
    %c64_i32 = arith.constant 64 : i32
    %66 = vector.broadcast %c64_i32 : i32 to vector<64x64xi32>
    %67 = arith.cmpi slt, %27, %66 : vector<64x64xi32>
    %68 = arith.andi %65, %67 : vector<64x64xi1>
    %c48_i32_18 = arith.constant 48 : i32
    %69 = vector.broadcast %c48_i32_18 : i32 to vector<64x64xi32>
    %70 = arith.cmpi sge, %28, %69 : vector<64x64xi32>
    %71 = arith.andi %68, %70 : vector<64x64xi1>
    %c64_i32_19 = arith.constant 64 : i32
    %72 = vector.broadcast %c64_i32_19 : i32 to vector<64x64xi32>
    %73 = arith.cmpi slt, %28, %72 : vector<64x64xi32>
    %74 = arith.andi %71, %73 : vector<64x64xi1>
    %75 = arith.ori %63, %74 : vector<64x64xi1>
    %76 = tpu.concatenate %26, %26, %26, %26 in 0 : vector<16x64xf32>, vector<16x64xf32>, vector<16x64xf32>, vector<16x64xf32> -> vector<64x64xf32>
    %77 = tpu.concatenate %16, %16, %16, %16 in 0 : vector<16x64xf32>, vector<16x64xf32>, vector<16x64xf32>, vector<16x64xf32> -> vector<64x64xf32>
    %cst_20 = arith.constant 0.000000e+00 : f32
    %78 = vector.broadcast %cst_20 : f32 to vector<64x64xf32>
    %79 = arith.select %75, %76, %78 : vector<64x64xi1>, vector<64x64xf32>
    %80 = arith.truncf %79 : vector<64x64xf32> to vector<64x64xbf16>
    %cst_21 = arith.constant 0.000000e+00 : f32
    %81 = vector.broadcast %cst_21 : f32 to vector<64x64xf32>
    %82 = arith.select %75, %77, %81 : vector<64x64xi1>, vector<64x64xf32>
    %83 = arith.truncf %82 : vector<64x64xf32> to vector<64x64xbf16>
    %84 = arith.truncf %23 : vector<16x64xf32> to vector<16x64xbf16>
    "tpu.trace_start"() <{level = 10 : i32, message = "rd,cd->rc"}> : () -> ()
    %cst_22 = arith.constant dense<0.000000e+00> : vector<16x64xf32>
    %85 = tpu.matmul %84, %80, %cst_22 {dimension_numbers = #tpu.dot_dimension_numbers<[1], [1], [0], [0], [0, 0, 1, 0], [], []>} : vector<16x64xbf16>, vector<64x64xbf16>, vector<16x64xf32> -> vector<16x64xf32>
    "tpu.trace_stop"() : () -> ()
    %86 = tpu.iota {dimensions = array<i32: 0>} : vector<16x16xi32>
    %87 = tpu.iota {dimensions = array<i32: 1>} : vector<16x16xi32>
    %c0_i32_23 = arith.constant 0 : i32
    %88 = vector.broadcast %c0_i32_23 : i32 to vector<16x16xi32>
    %89 = arith.cmpi sge, %86, %88 : vector<16x16xi32>
    %c8_i32 = arith.constant 8 : i32
    %90 = vector.broadcast %c8_i32 : i32 to vector<16x16xi32>
    %91 = arith.cmpi slt, %86, %90 : vector<16x16xi32>
    %92 = arith.andi %89, %91 : vector<16x16xi1>
    %c0_i32_24 = arith.constant 0 : i32
    %93 = vector.broadcast %c0_i32_24 : i32 to vector<16x16xi32>
    %94 = arith.cmpi sge, %87, %93 : vector<16x16xi32>
    %95 = arith.andi %92, %94 : vector<16x16xi1>
    %c8_i32_25 = arith.constant 8 : i32
    %96 = vector.broadcast %c8_i32_25 : i32 to vector<16x16xi32>
    %97 = arith.cmpi slt, %87, %96 : vector<16x16xi32>
    %98 = arith.andi %95, %97 : vector<16x16xi1>
    %c8_i32_26 = arith.constant 8 : i32
    %99 = vector.broadcast %c8_i32_26 : i32 to vector<16x16xi32>
    %100 = arith.cmpi sge, %86, %99 : vector<16x16xi32>
    %c16_i32_27 = arith.constant 16 : i32
    %101 = vector.broadcast %c16_i32_27 : i32 to vector<16x16xi32>
    %102 = arith.cmpi slt, %86, %101 : vector<16x16xi32>
    %103 = arith.andi %100, %102 : vector<16x16xi1>
    %c8_i32_28 = arith.constant 8 : i32
    %104 = vector.broadcast %c8_i32_28 : i32 to vector<16x16xi32>
    %105 = arith.cmpi sge, %87, %104 : vector<16x16xi32>
    %106 = arith.andi %103, %105 : vector<16x16xi1>
    %c16_i32_29 = arith.constant 16 : i32
    %107 = vector.broadcast %c16_i32_29 : i32 to vector<16x16xi32>
    %108 = arith.cmpi slt, %87, %107 : vector<16x16xi32>
    %109 = arith.andi %106, %108 : vector<16x16xi1>
    %110 = arith.ori %98, %109 : vector<16x16xi1>
    %111 = arith.cmpi sle, %87, %86 : vector<16x16xi32>
    %112 = arith.andi %110, %111 : vector<16x16xi1>
    %113 = vector.extract_strided_slice %85 {offsets = [0, 0], sizes = [16, 16], strides = [1, 1]} : vector<16x64xf32> to vector<16x16xf32>
    %cst_30 = arith.constant -1.000000e+30 : f32
    %114 = vector.broadcast %cst_30 : f32 to vector<16x16xf32>
    %115 = arith.select %112, %113, %114 : vector<16x16xi1>, vector<16x16xf32>
    %cst_31 = arith.constant dense<0xFF800000> : vector<16xf32>
    %116 = vector.multi_reduction <maximumf>, %115, %cst_31 [1] : vector<16x16xf32> to vector<16xf32>
    %117 = vector.shape_cast %116 : vector<16xf32> to vector<16x1xf32>
    %118 = vector.broadcast %117 : vector<16x1xf32> to vector<16x16xf32>
    %119 = arith.subf %115, %118 : vector<16x16xf32>
    %120 = math.exp %119 : vector<16x16xf32>
    %cst_32 = arith.constant dense<0.000000e+00> : vector<16xf32>
    %121 = vector.multi_reduction <add>, %120, %cst_32 [1] : vector<16x16xf32> to vector<16xf32>
    %122 = vector.shape_cast %121 : vector<16xf32> to vector<16x1xf32>
    %123 = tpu.reciprocal %122 {approx = true} : vector<16x1xf32> -> vector<16x1xf32>
    %124 = vector.broadcast %123 : vector<16x1xf32> to vector<16x16xf32>
    %125 = arith.mulf %120, %124 : vector<16x16xf32>
    %126 = vector.extract_strided_slice %85 {offsets = [0, 16], sizes = [16, 16], strides = [1, 1]} : vector<16x64xf32> to vector<16x16xf32>
    %cst_33 = arith.constant -1.000000e+30 : f32
    %127 = vector.broadcast %cst_33 : f32 to vector<16x16xf32>
    %128 = arith.select %112, %126, %127 : vector<16x16xi1>, vector<16x16xf32>
    %cst_34 = arith.constant dense<0xFF800000> : vector<16xf32>
    %129 = vector.multi_reduction <maximumf>, %128, %cst_34 [1] : vector<16x16xf32> to vector<16xf32>
    %130 = vector.shape_cast %129 : vector<16xf32> to vector<16x1xf32>
    %131 = vector.broadcast %130 : vector<16x1xf32> to vector<16x16xf32>
    %132 = arith.subf %128, %131 : vector<16x16xf32>
    %133 = math.exp %132 : vector<16x16xf32>
    %cst_35 = arith.constant dense<0.000000e+00> : vector<16xf32>
    %134 = vector.multi_reduction <add>, %133, %cst_35 [1] : vector<16x16xf32> to vector<16xf32>
    %135 = vector.shape_cast %134 : vector<16xf32> to vector<16x1xf32>
    %136 = tpu.reciprocal %135 {approx = true} : vector<16x1xf32> -> vector<16x1xf32>
    %137 = vector.broadcast %136 : vector<16x1xf32> to vector<16x16xf32>
    %138 = arith.mulf %133, %137 : vector<16x16xf32>
    %139 = vector.extract_strided_slice %85 {offsets = [0, 32], sizes = [16, 16], strides = [1, 1]} : vector<16x64xf32> to vector<16x16xf32>
    %cst_36 = arith.constant -1.000000e+30 : f32
    %140 = vector.broadcast %cst_36 : f32 to vector<16x16xf32>
    %141 = arith.select %112, %139, %140 : vector<16x16xi1>, vector<16x16xf32>
    %cst_37 = arith.constant dense<0xFF800000> : vector<16xf32>
    %142 = vector.multi_reduction <maximumf>, %141, %cst_37 [1] : vector<16x16xf32> to vector<16xf32>
    %143 = vector.shape_cast %142 : vector<16xf32> to vector<16x1xf32>
    %144 = vector.broadcast %143 : vector<16x1xf32> to vector<16x16xf32>
    %145 = arith.subf %141, %144 : vector<16x16xf32>
    %146 = math.exp %145 : vector<16x16xf32>
    %cst_38 = arith.constant dense<0.000000e+00> : vector<16xf32>
    %147 = vector.multi_reduction <add>, %146, %cst_38 [1] : vector<16x16xf32> to vector<16xf32>
    %148 = vector.shape_cast %147 : vector<16xf32> to vector<16x1xf32>
    %149 = tpu.reciprocal %148 {approx = true} : vector<16x1xf32> -> vector<16x1xf32>
    %150 = vector.broadcast %149 : vector<16x1xf32> to vector<16x16xf32>
    %151 = arith.mulf %146, %150 : vector<16x16xf32>
    %152 = vector.extract_strided_slice %85 {offsets = [0, 48], sizes = [16, 16], strides = [1, 1]} : vector<16x64xf32> to vector<16x16xf32>
    %cst_39 = arith.constant -1.000000e+30 : f32
    %153 = vector.broadcast %cst_39 : f32 to vector<16x16xf32>
    %154 = arith.select %112, %152, %153 : vector<16x16xi1>, vector<16x16xf32>
    %cst_40 = arith.constant dense<0xFF800000> : vector<16xf32>
    %155 = vector.multi_reduction <maximumf>, %154, %cst_40 [1] : vector<16x16xf32> to vector<16xf32>
    %156 = vector.shape_cast %155 : vector<16xf32> to vector<16x1xf32>
    %157 = vector.broadcast %156 : vector<16x1xf32> to vector<16x16xf32>
    %158 = arith.subf %154, %157 : vector<16x16xf32>
    %159 = math.exp %158 : vector<16x16xf32>
    %cst_41 = arith.constant dense<0.000000e+00> : vector<16xf32>
    %160 = vector.multi_reduction <add>, %159, %cst_41 [1] : vector<16x16xf32> to vector<16xf32>
    %161 = vector.shape_cast %160 : vector<16xf32> to vector<16x1xf32>
    %162 = tpu.reciprocal %161 {approx = true} : vector<16x1xf32> -> vector<16x1xf32>
    %163 = vector.broadcast %162 : vector<16x1xf32> to vector<16x16xf32>
    %164 = arith.mulf %159, %163 : vector<16x16xf32>
    %165 = tpu.concatenate %125, %138, %151, %164 in 1 : vector<16x16xf32>, vector<16x16xf32>, vector<16x16xf32>, vector<16x16xf32> -> vector<16x64xf32>
    %166 = arith.truncf %165 : vector<16x64xf32> to vector<16x64xbf16>
    %cst_42 = arith.constant dense<0.000000e+00> : vector<16x64xf32>
    %167 = tpu.matmul %166, %83, %cst_42 {dimension_numbers = #tpu.dot_dimension_numbers<[1], [0], [0], [1], [0, 0, 1, 1], [], []>} : vector<16x64xbf16>, vector<64x64xbf16>, vector<16x64xf32> -> vector<16x64xf32>
    %168 = arith.truncf %167 : vector<16x64xf32> to vector<16x64xbf16>
    %c0_43 = arith.constant 0 : index
    %c0_44 = arith.constant 0 : index
    %169 = vector.load %arg4[%c0_43, %c0_44] : memref<256x128xbf16, #tpu.memory_space<vmem>>, vector<64x64xbf16>
    %cst_45 = arith.constant dense<0.000000e+00> : vector<16x64xf32>
    %170 = tpu.matmul %168, %169, %cst_45 {dimension_numbers = #tpu.dot_dimension_numbers<[1], [0], [0], [1], [0, 0, 1, 1], [], []>} : vector<16x64xbf16>, vector<64x64xbf16>, vector<16x64xf32> -> vector<16x64xf32>
    %171 = arith.addf %0, %170 : vector<16x64xf32>
    %172 = arith.mulf %171, %171 : vector<16x64xf32>
    %cst_46 = arith.constant dense<0.000000e+00> : vector<16xf32>
    %173 = vector.multi_reduction <add>, %172, %cst_46 [1] : vector<16x64xf32> to vector<16xf32>
    %174 = vector.shape_cast %173 : vector<16xf32> to vector<16x1xf32>
    %cst_47 = arith.constant 6.400000e+01 : f32
    %175 = vector.broadcast %cst_47 : f32 to vector<16x1xf32>
    %176 = arith.divf %174, %175 : vector<16x1xf32>
    %cst_48 = arith.constant 9.99999974E-6 : f32
    %177 = vector.broadcast %cst_48 : f32 to vector<16x1xf32>
    %178 = arith.addf %176, %177 : vector<16x1xf32>
    %179 = math.rsqrt %178 : vector<16x1xf32>
    %180 = vector.broadcast %179 : vector<16x1xf32> to vector<16x64xf32>
    %181 = arith.mulf %171, %180 : vector<16x64xf32>
    %182 = arith.truncf %181 : vector<16x64xf32> to vector<16x64xbf16>
    %c0_49 = arith.constant 0 : index
    %c384 = arith.constant 384 : index
    %183 = vector.load %arg3[%c0_49, %c384] : memref<64x896xbf16, #tpu.memory_space<vmem>>, vector<64x512xbf16>
    %cst_50 = arith.constant dense<0.000000e+00> : vector<16x512xf32>
    %184 = tpu.matmul %182, %183, %cst_50 {dimension_numbers = #tpu.dot_dimension_numbers<[1], [0], [0], [1], [0, 0, 1, 1], [], []>} : vector<16x64xbf16>, vector<64x512xbf16>, vector<16x512xf32> -> vector<16x512xf32>
    %185 = vector.extract_strided_slice %184 {offsets = [0, 0], sizes = [16, 256], strides = [1, 1]} : vector<16x512xf32> to vector<16x256xf32>
    %186 = vector.extract_strided_slice %184 {offsets = [0, 256], sizes = [16, 256], strides = [1, 1]} : vector<16x512xf32> to vector<16x256xf32>
    %187 = arith.negf %185 : vector<16x256xf32>
    %188 = math.exp %187 : vector<16x256xf32>
    %cst_51 = arith.constant 1.000000e+00 : f32
    %189 = vector.broadcast %cst_51 : f32 to vector<16x256xf32>
    %190 = arith.addf %189, %188 : vector<16x256xf32>
    %191 = arith.divf %189, %190 : vector<16x256xf32>
    %192 = arith.mulf %185, %191 : vector<16x256xf32>
    %193 = arith.mulf %192, %186 : vector<16x256xf32>
    %194 = arith.truncf %193 : vector<16x256xf32> to vector<16x256xbf16>
    %c0_52 = arith.constant 0 : index
    %c64_53 = arith.constant 64 : index
    %195 = vector.load %arg4[%c0_52, %c64_53] : memref<256x128xbf16, #tpu.memory_space<vmem>>, vector<256x64xbf16>
    %cst_54 = arith.constant dense<0.000000e+00> : vector<16x64xf32>
    %196 = tpu.matmul %194, %195, %cst_54 {dimension_numbers = #tpu.dot_dimension_numbers<[1], [0], [0], [1], [0, 0, 1, 1], [], []>} : vector<16x256xbf16>, vector<256x64xbf16>, vector<16x64xf32> -> vector<16x64xf32>
    %197 = arith.addf %171, %196 : vector<16x64xf32>
    %c0_55 = arith.constant 0 : index
    %c0_56 = arith.constant 0 : index
    %198 = vector.load %arg5[%c0_55, %c0_56] : memref<16x64xf32, #tpu.memory_space<vmem>>, vector<16x64xf32>
    tpu.vector_store %arg5[%c0_55, %c0_56], %197 {strides = array<i32>} : memref<16x64xf32, #tpu.memory_space<vmem>>, vector<16x64xf32>,
    return
  }
  func.func @transform_0(%arg0: i32) -> (i32, i32) {
    %c0_i32 = arith.constant 0 : i32
    %c0_i32_0 = arith.constant 0 : i32
    %c0_i32_1 = arith.constant 0 : i32
    return %c0_i32, %c0_i32_0 : i32, i32
  }
  func.func @transform_1(%arg0: i32) -> (i32, i32) {
    %c0_i32 = arith.constant 0 : i32
    %c0_i32_0 = arith.constant 0 : i32
    %c0_i32_1 = arith.constant 0 : i32
    return %c0_i32, %c0_i32_0 : i32, i32
  }
  func.func @transform_2(%arg0: i32) -> (i32, i32) {
    %c0_i32 = arith.constant 0 : i32
    %c0_i32_0 = arith.constant 0 : i32
    %c0_i32_1 = arith.constant 0 : i32
    return %c0_i32, %c0_i32_0 : i32, i32
  }
  func.func @transform_3(%arg0: i32) -> (i32, i32) {
    %c0_i32 = arith.constant 0 : i32
    %c0_i32_0 = arith.constant 0 : i32
    %c0_i32_1 = arith.constant 0 : i32
    return %c0_i32, %c0_i32_0 : i32, i32
  }
  func.func @transform_4(%arg0: i32) -> (i32, i32) {
    %c0_i32 = arith.constant 0 : i32
    %c0_i32_0 = arith.constant 0 : i32
    %c0_i32_1 = arith.constant 0 : i32
    return %c0_i32, %c0_i32_0 : i32, i32
  }
}

</mosaic_0001>

<bundles_post_ra>
// kernel: tpu_custom_call.1
= control target key start
LH: loop header
LB: loop body
LE: loop exit
PB: predicated region body
PF: predicated region fallthrough
CT: control target
= control target key end

     0   :  { %9 = vsyncpa [#allocation3], 0  ;;  %s2066_s0 = inlined_call_operand.hbm [shape: f32[16,64], index: 0, kind: input, shape index: {}]   ;;  %s2067_s1 = inlined_call_operand.hbm [shape: f32[16,128], index: 1, kind: input, shape index: {}]   ;;  %s2068_s2 = inlined_call_operand.hbm [shape: bf16[64,896], index: 2, kind: input, shape index: {}]   ;;  %s2069_s3 = inlined_call_operand.hbm [shape: bf16[256,128], index: 3, kind: input, shape index: {}]   ;;  %s2070_s4 = inlined_call_operand.hbm [shape: f32[16,64], index: 4, kind: output, shape index: {}]  }
   0x1   :  { %10 = vsyncpa [#allocation6], 0 }
   0x2   :  { %11 = vsyncpa [#allocation9], 0 }
   0x3   :  { %12 = vsyncpa [#allocation4], 0  ;;  %s30_s17 = sshll.u32 %s2067_s1, 4  ;;  %s1777_s18 = smov [#allocation5]   ;;  %s31_s17 = int_to_ptr.hbm [resolvable:$true] %s30_s17 }
   0x4   :  { %s32_s19 = sshll.u32 %s1777_s18, 4  ;;  %s17_s22 = sshll.u32 %s2066_s0, 4  ;;  %s33_s19 = int_to_ptr.vmem [resolvable:$true] %s32_s19  ;;  %s18_s22 = int_to_ptr.hbm [resolvable:$true] %s17_s22 }
   0x5   :  { %s1778_s23 = smov 128   ;;  %s1779_s24 = smov 8  }
   0x6   :  { %38 = dma.hbm_to_vmem [thread:$0]  %s31_s17, 256, %s33_s19, [#allocation6], %s1778_s23, %s1778_s23, %s1779_s24  }
   0x7   :  { %s1780_s25 = smov [#allocation2]   ;;  %s43_s1 = sshll.u32 %s2068_s2, 4  ;;  %s44_s1 = int_to_ptr.hbm [resolvable:$true] %s43_s1 }
   0x8   :  { %s19_s26 = sshll.u32 %s1780_s25, 4  ;;  %s1781_s0 = smov [#allocation7]   ;;  %s20_s26 = int_to_ptr.vmem [resolvable:$true] %s19_s26 }
   0x9   :  { %25 = dma.hbm_to_vmem [thread:$0]  %s18_s22, 256, %s20_s26, [#allocation3], %s1778_s23, %s1778_s23, %s1779_s24  }
   0xa   :  { %s45_s29 = sshll.u32 %s1781_s0, 4  ;;  %s56_s6 = sshll.u32 %s2069_s3, 4  ;;  %s46_s29 = int_to_ptr.vmem [resolvable:$true] %s45_s29  ;;  %s57_s6 = int_to_ptr.hbm [resolvable:$true] %s56_s6 }
   0xb   :  { %s1782_s7 = smov 448   ;;  %s1783_s8 = smov 28  }
   0xc   :  { %51 = dma.hbm_to_vmem [thread:$0]  %s44_s1, 3584, %s46_s29, [#allocation6], %s1782_s7, %s1782_s7, %s1783_s8  }
   0xd   :  { %s1784_s9 = smov [#allocation8]   ;;  %s1785_s2 = smov 64  }
   0xe   :  { %s58_s10 = sshll.u32 %s1784_s9, 4  ;;  %s1786_s11 = smov 4   ;;  %s59_s10 = int_to_ptr.vmem [resolvable:$true] %s58_s10 }
   0xf   :  { %64 = dma.hbm_to_vmem [thread:$0]  %s57_s6, 2048, %s59_s10, [#allocation9], %s1785_s2, %s1785_s2, %s1786_s11  }
  0x10   :  { %1769 = dma.done.wait [#allocation3], 256  }
  0x11   :  { %1770 = vsyncadd [#allocation3], 4294967040 }
  0x12   :  { %1771 = dma.done.wait [#allocation6], 3840  }
  0x13   :  { %1772 = vsyncadd [#allocation6], 4294963456 }
  0x14   :  { %1773 = dma.done.wait [#allocation9], 2048  }
  0x15   :  { %1774 = vsyncadd [#allocation9], 4294965248  ;;  %v1840_v0 = vld [vmem:[#allocation2] sm:$0xff]  ;;  %vm86_vm0 = vcmask 523264   ;;  %v1844_v2 = vld [vmem:[#allocation2 + $0x8] sm:$0xff]  ;;  %v1787_v6 = vmov 64.0  }
  0x16   :  { %v84_v1 = vmul.f32 %v1840_v0, %v1840_v0  ;;  %v85_v4 = vmul.f32 %v1844_v2, %v1844_v2  ;;  %1591 = vrcp.f32 %v1787_v6  ;;  %v1325_v9 = vld [vmem:[#allocation7 + $0xa8] sm:$0xf]  ;;  %v1515_v10 = vld [vmem:[#allocation7 + $0xc0] sm:$0xf0]  ;;  %v1333_v11 = vld [vmem:[#allocation7 + $0xb0] sm:$0xf] }
  0x17   :  { %v1326_v13 = vor.u32 %v1515_v10, %v1325_v9  ;;  %v1516_v14 = vld [vmem:[#allocation7 + $0xc8] sm:$0xf0]  ;;  %v1313_v16 = vld [vmem:[#allocation7 + $0x70] sm:$0xf]  ;;  %v1321_v18 = vld [vmem:[#allocation7 + $0x78] sm:$0xf] }
  0x18   :  { %v87_v3 = vsel %vm86_vm0, %v84_v1, 0.0  ;;  %v90_v5 = vsel %vm86_vm0, %v85_v4, 0.0  ;;  %v1334_v15 = vor.u32 %v1516_v14, %v1333_v11  ;;  %v1512_v17 = vld [vmem:[#allocation7 + $0x88] sm:$0xf0]  ;;  %v1513_v21 = vld [vmem:[#allocation7 + $0x90] sm:$0xf0] }
  0x19   :  { %88 = vadd.xlane.f32.xlu0 %v87_v3  ;;  %214 = vmatpush.bf16.msra.mxu1 %v1326_v13  ;;  %v1314_v20 = vor.u32 %v1512_v17, %v1313_v16  ;;  %v1322_v22 = vor.u32 %v1513_v21, %v1321_v18  ;;  %v1301_v23 = vld [vmem:[#allocation7 + $0x38] sm:$0xf]  ;;  %v1509_v24 = vld [vmem:[#allocation7 + $0x50] sm:$0xf0]  ;;  %v1309_v25 = vld [vmem:[#allocation7 + $0x40] sm:$0xf]  ;;  %v290_v18 = vlaneseq }
  0x1a   :  { %242 = vmatpush.bf16.msra.mxu2 %v1334_v15  ;;  %v1302_v27 = vor.u32 %v1509_v24, %v1301_v23  ;;  %v1510_v28 = vld [vmem:[#allocation7 + $0x58] sm:$0xf0]  ;;  %v1289_v30 = vld [vmem:[#allocation7] sm:$0xf]  ;;  %v1297_v32 = vld [vmem:[#allocation7 + $0x8] sm:$0xf] }
  0x1b   :  { %v1310_v29 = vor.u32 %v1510_v28, %v1309_v25  ;;  %v1506_v31 = vld [vmem:[#allocation7 + $0x18] sm:$0xf0]  ;;  %v1507_v34 = vld [vmem:[#allocation7 + $0x20] sm:$0xf0]  ;;  %v1514_v39 = vld [vmem:[#allocation7 + $0xac] sm:$0xf] }
  0x1c   :  { %v1592_v7 = vpop.eup %1591  ;;  %v1290_v33 = vor.u32 %v1506_v31, %v1289_v30  ;;  %v1298_v36 = vor.u32 %v1507_v34, %v1297_v32  ;;  %v1327_v40 = vld [vmem:[#allocation7 + $0xc4] sm:$0xf0]  ;;  %v1511_v43 = vld [vmem:[#allocation7 + $0x74] sm:$0xf]  ;;  %v1315_v44 = vld [vmem:[#allocation7 + $0x8c] sm:$0xf0] }
  0x1d   :  { %v94_v8 = vmul.f32 64.0, %v1592_v7  ;;  %215 = vmatpush.bf16.msra.mxu1 %v1314_v20  ;;  %vm98_vm1 = vweird.f32 %v1592_v7  ;;  %v1330_v41 = vor.u32 %v1514_v39, %v1327_v40  ;;  %v1318_v45 = vor.u32 %v1511_v43, %v1315_v44  ;;  %v1853_v46 = vld [vmem:[#allocation5] sm:$0xff]  ;;  %v1508_v47 = vld [vmem:[#allocation7 + $0x3c] sm:$0xf]  ;;  %v1303_v48 = vld [vmem:[#allocation7 + $0x54] sm:$0xf0] }
  0x1e   :  { %243 = vmatpush.bf16.msra.mxu2 %v1322_v22  ;;  %270 = vrot.lane.b32.xlu1 %v1853_v46, %s1785_s2  ;;  %v1306_v50 = vor.u32 %v1508_v47, %v1303_v48  ;;  %v1505_v52 = vld [vmem:[#allocation7 + $0x4] sm:$0xf]  ;;  %v1291_v53 = vld [vmem:[#allocation7 + $0x1c] sm:$0xf0]  ;;  %v1858_v61 = vld [vmem:[#allocation5 + $0x8] sm:$0xff]  ;;  %v1869_v21 = vand.u32 127, %v290_v18 }
  0x1f   :  { %v95_v12 = vsub.f32 1.0, %v94_v8  ;;  %v1294_v57 = vor.u32 %v1505_v52, %v1291_v53  ;;  %s1788_s3 = smov 80   ;;  %s1789_s12 = smov 112  }
  0x20   :  { %vm467_vm8 = vcmp.ge.s32.totalorder %v1869_v21, 48  ;;  %vm476_vm9 = vcmp.lt.s32.totalorder %v1869_v21, 64  ;;  %vm417_vm11 = vcmp.ge.s32.totalorder %v1869_v21, 32  ;;  %vm426_vm12 = vcmp.lt.s32.totalorder %v1869_v21, 48  ;;  %s1790_s13 = smov 96   ;;  %s1791_s14 = smov 16  }
  0x21   :  { %91 = vadd.xlane.f32.xlu0 %v90_v5  ;;  %v96_v19 = vmul.f32 %v1592_v7, %v95_v12  ;;  %216 = vmatpush.bf16.msra.mxu1 %v1302_v27  ;;  %vm1876_vm10 = vmand %vm467_vm8, %vm476_vm9  ;;  %vm367_vm15 = vcmp.ge.s32.totalorder %v1869_v21, 16  ;;  %s1792_s15 = smov 32   ;;  %s1793_s16 = smov 48  }
  0x22   :  { %244 = vmatpush.bf16.msra.mxu2 %v1310_v29  ;;  %vm1339_vm13 = vmpackc.low %vm1876_vm10, %vm1876_vm10  ;;  %s1794_s17 = smov [#allocation10]   ;;  %s1272_s21 = sshll.u32 %s2070_s4, 4  ;;  %s1273_s21 = int_to_ptr.hbm [resolvable:$true] %s1272_s21 }
  0x23   :  { %v97_v26 = vadd.f32 %v1592_v7, %v96_v19  ;;  %vm1886_vm14 = vmand %vm417_vm11, %vm426_vm12  ;;  %vm581_vm11 = vcmask 130048   ;;  %vm561_vm12 = vcmp.lt.s32.totalorder %v1869_v21, 8  ;;  %s1270_s18 = sshll.u32 %s1794_s17, 4  ;;  %s1271_s18 = int_to_ptr.vmem [resolvable:$true] %s1270_s18 }
  0x25   :  { %v1850_v35 = vsel %vm98_vm1, %v1592_v7, %v97_v26  ;;  %217 = vmatpush.bf16.msra.mxu1 %v1290_v33  ;;  %vm376_vm1 = vcmp.lt.s32.totalorder %v1869_v21, 32 }
  0x26   :  { %245 = vmatpush.bf16.msra.mxu2 %v1298_v36  ;;  %272 = vrot.lane.b32.xlu1 %v1858_v61, %s1785_s2 }
  0x29   :  { %228 = vmatpush.bf16.msrb.mxu1 %v1330_v41 }
  0x2d   :  { %229 = vmatpush.bf16.msrb.mxu1 %v1318_v45 }
  0x31   :  { %230 = vmatpush.bf16.msrb.mxu1 %v1306_v50 }
  0x35   :  { %231 = vmatpush.bf16.msrb.mxu1 %v1294_v57 }
  0x8c   :  { %v89_v37 = vpop.xlane.xlu0 %88 }
  0x8d   :  { %v100_v38 = vmul.f32 %v1850_v35, %v89_v37 }
  0x8f   :  { %v102_v42 = vadd.f32 1e-05, %v100_v38 }
  0x90   :  { %v271_v12 = vpop.permute.xlu1 %270 }
  0x91   :  { %1593 = vrsqrt.f32 %v102_v42  ;;  %vm110_vm3 = vweird.f32 %v102_v42 }
  0x94   :  { %v92_v49 = vpop.xlane.xlu0 %91 }
  0x95   :  { %v101_v51 = vmul.f32 %v1850_v35, %v92_v49 }
  0x97   :  { %v1594_v54 = vpop.eup %1593  ;;  %v103_v55 = vadd.f32 1e-05, %v101_v51 }
  0x98   :  { %v105_v56 = vmul.f32 %v1594_v54, %v102_v42  ;;  %vm111_vm2 = vweird.f32 %v1594_v54  ;;  %v273_v19 = vpop.permute.xlu1 %272 }
  0x99   :  { %1595 = vrsqrt.f32 %v103_v55  ;;  %vm112_vm5 = vmor %vm110_vm3, %vm111_vm2  ;;  %vm120_vm6 = vweird.f32 %v103_v55 }
  0x9a   :  { %v106_v58 = vmul.f32 %v1594_v54, %v105_v56  ;;  %vm1342_vm2 = vmpackc.low %vm1886_vm14, %vm1886_vm14 }
  0x9b   :  { %vm1896_vm3 = vmand %vm367_vm15, %vm376_vm1  ;;  %vm722_vm15 = vcmask 261120   ;;  %vm725_vm1 = vcmask 392192  }
  0x9c   :  { %v107_v59 = vmul.f32 0.5, %v106_v58 }
  0x9e   :  { %v108_v62 = vsub.f32 1.5, %v107_v59 }
  0x9f   :  { %v1596_v60 = vpop.eup %1595 }
  0xa0   :  { %v115_v63 = vmul.f32 %v1596_v60, %v103_v55  ;;  %v109_v3 = vmul.f32 %v1594_v54, %v108_v62  ;;  %vm121_vm4 = vweird.f32 %v1596_v60 }
  0xa1   :  { %vm122_vm7 = vmor %vm120_vm6, %vm121_vm4 }
  0xa2   :  { %v116_v1 = vmul.f32 %v1596_v60, %v115_v63  ;;  %v113_v7 = vsel %vm112_vm5, %v1594_v54, %v109_v3  ;;  %vm1345_vm4 = vmpackc.low %vm1896_vm3, %vm1896_vm3  ;;  %vm334_vm5 = vcmp.lt.s32.totalorder %v1869_v21, 16 }
  0xa3   :  { %v124_v9 = vmul.f32 %v113_v7, %v1840_v0  ;;  %vm1348_vm6 = vmpackc.low %vm334_vm5, %vm334_vm5 }
  0xa4   :  { %v117_v4 = vmul.f32 0.5, %v116_v1 }
  0xa6   :  { %v118_v5 = vsub.f32 1.5, %v117_v4  ;;  %v291_v4 = vshrl.u32 %v290_v18, 7 }
  0xa8   :  { %v119_v6 = vmul.f32 %v1596_v60, %v118_v5  ;;  %v292_v5 = vadd.s32 8, %v291_v4 }
  0xaa   :  { %v123_v8 = vsel %vm122_vm7, %v1596_v60, %v119_v6  ;;  %vm568_vm7 = vcmp.ge.s32.totalorder %v1869_v21, 8  ;;  %vm576_vm9 = vcmp.le.s32.totalorder %v1869_v21, %v292_v5 }
  0xab   :  { %v125_v10 = vmul.f32 %v123_v8, %v1844_v2  ;;  %vm572_vm8 = vmand %vm568_vm7, %vm334_vm5 }
  0xad   :  { %v126_v11 = vpack.c.bf16 %v125_v10, %v124_v9 }
  0xaf   :  { %1335 = vmatmul.msk.bf16.vlgmr.msra.gmra.mxu1 %vm86_vm0, %v126_v11  ;;  %1337 = vmatmul.msk.bf16.vlgmr.msra.gmra.mxu2 %vm86_vm0, %v126_v11 }
  0xbf   :  { %1336 = vmatmul.msk.bf16.vlgmr.msrb.gmra.mxu1 %vm86_vm0, %v126_v11 }
 0x12c   :  { %v219_v13 = vpop.f32.mrf.mxu1 }
 0x12d   :  { %v276_v14 = vmul.f32 %v271_v12, %v219_v13  ;;  %v254_v39 = vmul.f32 %v1853_v46, %v219_v13 }
 0x132   :  { %v247_v15 = vpop.f32.mrf.mxu2 }
 0x133   :  { %v278_v16 = vmul.f32 %v271_v12, %v247_v15 }
 0x134   :  { %v221_v17 = vpop.f32.mrf.mxu1 }
 0x135   :  { %282 = vrot.lane.b32.xlu2 %v278_v16, %s1785_s2  ;;  %v277_v32 = vmul.f32 %v273_v19, %v221_v17  ;;  %v255_v40 = vmul.f32 %v1858_v61, %v221_v17 }
 0x13a   :  { %v249_v20 = vpop.f32.mrf.mxu2 }
 0x13b   :  { %v279_v22 = vmul.f32 %v273_v19, %v249_v20 }
 0x13c   :  { %v233_v23 = vpop.f32.mrf.mxu1 }
 0x13d   :  { %284 = vrot.lane.b32.xlu2 %v279_v22, %s1785_s2  ;;  %v256_v24 = vmul.f32 %v1853_v46, %v233_v23 }
 0x13f   :  { %260 = vrot.lane.b32.xlu1 %v256_v24, %s1785_s2 }
 0x144   :  { %v235_v26 = vpop.f32.mrf.mxu1 }
 0x145   :  { %v1340_v27 = vpack.c.bf16 %v235_v26, %v233_v23  ;;  %v257_v28 = vmul.f32 %v1858_v61, %v235_v26 }
 0x147   :  { %1341 = vmatpush.bf16.msk.msra.mxu0 %vm1339_vm13, %v1340_v27  ;;  %262 = vrot.lane.b32.xlu2 %v257_v28, %s1785_s2  ;;  %vm575_vm13 = vcmp.le.s32.totalorder %v1869_v21, %v291_v4 }
 0x14b   :  { %1344 = vmatpush.bf16.msk.msra.mxu0 %vm1342_vm2, %v1340_v27 }
 0x14f   :  { %1347 = vmatpush.bf16.msk.msra.mxu0 %vm1345_vm4, %v1340_v27 }
 0x153   :  { %1350 = vmatpush.bf16.msk.msra.mxu0 %vm1348_vm6, %v1340_v27 }
 0x18f   :  { %v283_v31 = vpop.permute.xlu2 %282 }
 0x190   :  { %v288_v34 = vadd.f32 %v283_v31, %v276_v14 }
 0x197   :  { %v285_v33 = vpop.permute.xlu2 %284 }
 0x198   :  { %v289_v36 = vadd.f32 %v285_v33, %v277_v32 }
 0x19a   :  { %v1571_v37 = vpack.i.bf16 %v289_v36, %v288_v34 }
 0x19c   :  { %1572 = vrot.lane.b32.xlu0 %v1571_v37, %s1785_s2 }
 0x1a1   :  { %v263_v38 = vpop.permute.xlu2 %262 }
 0x1a2   :  { %v267_v42 = vadd.f32 %v263_v38, %v255_v40 }
 0x1b1   :  { %v261_v41 = vpop.permute.xlu1 %260 }
 0x1b2   :  { %v266_v43 = vadd.f32 %v261_v41, %v254_v39 }
 0x1b4   :  { %v525_v44 = vpack.c.bf16 %v267_v42, %v266_v43 }
 0x20e   :  { %v1573_v45 = vpop.permute.xlu0 %1572 }
 0x20f   :  { %v1575_v47 = vunpack.i.h.bf16 %v1573_v45  ;;  %v1574_v48 = vunpack.i.l.bf16 %v1573_v45 }
 0x211   :  { %v507_v49 = vsel %vm1876_vm10, %v1574_v48, 0.0  ;;  %v508_v50 = vsel %vm1876_vm10, %v1575_v47, 0.0  ;;  %v505_v46 = vsel %vm1886_vm14, %v1574_v48, 0.0  ;;  %v506_v53 = vsel %vm1886_vm14, %v1575_v47, 0.0  ;;  %vm1936_vm10 = vmand %vm572_vm8, %vm576_vm9 }
 0x212   :  { %v512_v51 = vpack.c.bf16 %v508_v50, %v507_v49  ;;  %v511_v54 = vpack.c.bf16 %v506_v53, %v505_v46  ;;  %v503_v56 = vsel %vm1896_vm3, %v1574_v48, 0.0  ;;  %v504_v57 = vsel %vm1896_vm3, %v1575_v47, 0.0  ;;  %vm1945_vm14 = vmand %vm561_vm12, %vm575_vm13 }
 0x213   :  { %v510_v58 = vpack.c.bf16 %v504_v57, %v503_v56  ;;  %v501_v60 = vsel %vm334_vm5, %v1574_v48, 0.0  ;;  %v502_v61 = vsel %vm334_vm5, %v1575_v47, 0.0 }
 0x214   :  { %v539_v52 = vsel %vm86_vm0, %v512_v51, 0  ;;  %v536_v55 = vsel %vm86_vm0, %v511_v54, 0  ;;  %v509_v62 = vpack.c.bf16 %v502_v61, %v501_v60 }
 0x215   :  { %545 = vmatpush.bf16.xpose.msra.mxu3 %v539_v52  ;;  %v533_v59 = vsel %vm86_vm0, %v510_v58, 0 }
 0x216   :  { %v530_v63 = vsel %vm86_vm0, %v509_v62, 0 }
 0x21d   :  { %546 = vmatpush.bf16.xpose.msra.mxu3 %v536_v55 }
 0x225   :  { %547 = vmatpush.bf16.xpose.msra.mxu3 %v533_v59 }
 0x22d   :  { %548 = vmatpush.bf16.xpose.msra.mxu3 %v530_v63 }
 0x234   :  { %1338 = vmatmul.msk.bf16.vlgmr.msra.gmra.mxu3 %vm86_vm0, %v525_v44 }
 0x2b7   :  { %v550_v1 = vpop.f32.mrf.mxu3 }
 0x2b8   :  { %666 = vrot.lane.b32.xlu0 %v550_v1, %s1788_s3  ;;  %606 = vrot.lane.b32.xlu1 %v550_v1, %s1789_s12  ;;  %v579_v25 = vsel %vm1945_vm14, %v550_v1, -1e+30 }
 0x2b9   :  { %v582_v28 = vsel %vm581_vm11, %v579_v25, -inf }
 0x2bf   :  { %v552_v3 = vpop.f32.mrf.mxu3 }
 0x2c0   :  { %636 = vrot.lane.b32.xlu1 %v550_v1, %s1790_s13  ;;  %608 = vrot.lane.b32.xlu2 %v552_v3, %s1789_s12  ;;  %v580_v20 = vsel %vm1936_vm10, %v552_v3, -1e+30 }
 0x2c1   :  { %v585_v24 = vsel %vm581_vm11, %v580_v20, -inf }
 0x2c8   :  { %668 = vrot.lane.b32.xlu1 %v552_v3, %s1788_s3  ;;  %638 = vrot.lane.b32.xlu2 %v552_v3, %s1790_s13 }
 0x31a   :  { %v609_v7 = vpop.permute.xlu2 %608 }
 0x31b   :  { %v613_v8 = vsel %vm1936_vm10, %v609_v7, -1e+30 }
 0x31c   :  { %v617_v9 = vsel %vm581_vm11, %v613_v8, -inf }
 0x31d   :  { %618 = vmax.xlane.f32.xlu0 %v617_v9 }
 0x322   :  { %v639_v17 = vpop.permute.xlu2 %638 }
 0x323   :  { %v643_v18 = vsel %vm1936_vm10, %v639_v17, -1e+30 }
 0x324   :  { %v647_v23 = vsel %vm581_vm11, %v643_v18, -inf }
 0x32a   :  { %v667_v11 = vpop.permute.xlu0 %666  ;;  %v607_v12 = vpop.permute.xlu1 %606 }
 0x32b   :  { %v672_v13 = vsel %vm1945_vm14, %v667_v11, -1e+30  ;;  %v612_v14 = vsel %vm1945_vm14, %v607_v12, -1e+30 }
 0x32c   :  { %v614_v15 = vsel %vm581_vm11, %v612_v14, -inf  ;;  %v674_v16 = vsel %vm581_vm11, %v672_v13, -inf }
 0x32d   :  { %615 = vmax.xlane.f32.xlu2 %v614_v15  ;;  %675 = vmax.xlane.f32.xlu0 %v674_v16 }
 0x332   :  { %v637_v19 = vpop.permute.xlu1 %636 }
 0x333   :  { %v642_v21 = vsel %vm1945_vm14, %v637_v19, -1e+30 }
 0x334   :  { %v644_v22 = vsel %vm581_vm11, %v642_v21, -inf }
 0x335   :  { %645 = vmax.xlane.f32.xlu1 %v644_v22  ;;  %648 = vmax.xlane.f32.xlu2 %v647_v23 }
 0x336   :  { %586 = vmax.xlane.f32.xlu0 %v585_v24 }
 0x33a   :  { %v669_v26 = vpop.permute.xlu1 %668 }
 0x33b   :  { %v673_v27 = vsel %vm1936_vm10, %v669_v26, -1e+30 }
 0x33c   :  { %v677_v29 = vsel %vm581_vm11, %v673_v27, -inf }
 0x33d   :  { %583 = vmax.xlane.f32.xlu1 %v582_v28  ;;  %678 = vmax.xlane.f32.xlu2 %v677_v29 }
 0x390   :  { %v619_v30 = vpop.xlane.xlu0 %618 }
 0x391   :  { %v621_v31 = vsub.f32 %v613_v8, %v619_v30  ;;  %v1520_v30 = vld [vmem:[#allocation8 + $0x18] sm:$0xff] }
 0x392   :  { %786 = vmatpush.bf16.msra.mxu1 %v1520_v30  ;;  %v1528_v30 = vld [vmem:[#allocation7 + $0x64] sm:$0xf0] }
 0x393   :  { %v624_v32 = vmul.f32 1.442695, %v621_v31  ;;  %v1519_v31 = vld [vmem:[#allocation8 + $0x10] sm:$0xff] }
 0x395   :  { %1597 = vpow2.f32 %v624_v32 }
 0x396   :  { %787 = vmatpush.bf16.msra.mxu1 %v1519_v31 }
 0x39b   :  { %v1598_v33 = vpop.eup %1597 }
 0x39c   :  { %v629_v34 = vsel %vm581_vm11, %v1598_v33, 0.0 }
 0x39d   :  { %630 = vadd.xlane.f32.xlu1 %v629_v34 }
 0x3a0   :  { %v676_v36 = vpop.xlane.xlu0 %675  ;;  %v616_v37 = vpop.xlane.xlu2 %615 }
 0x3a1   :  { %v680_v38 = vsub.f32 %v672_v13, %v676_v36  ;;  %v620_v39 = vsub.f32 %v612_v14, %v616_v37 }
 0x3a3   :  { %v682_v40 = vmul.f32 1.442695, %v680_v38  ;;  %v622_v41 = vmul.f32 1.442695, %v620_v39 }
 0x3a5   :  { %1599 = vpow2.f32 %v682_v40 }
 0x3a6   :  { %1601 = vpow2.f32 %v622_v41 }
 0x3a8   :  { %v646_v42 = vpop.xlane.xlu1 %645  ;;  %v649_v43 = vpop.xlane.xlu2 %648 }
 0x3a9   :  { %v650_v44 = vsub.f32 %v642_v21, %v646_v42  ;;  %v651_v45 = vsub.f32 %v643_v18, %v649_v43  ;;  %v587_v47 = vpop.xlane.xlu0 %586 }
 0x3aa   :  { %v589_v48 = vsub.f32 %v580_v20, %v587_v47 }
 0x3ab   :  { %v1971_v49 = vpop.eup %1599  ;;  %v652_v50 = vmul.f32 1.442695, %v650_v44  ;;  %v654_v51 = vmul.f32 1.442695, %v651_v45 }
 0x3ac   :  { %v1602_v52 = vpop.eup %1601  ;;  %v592_v46 = vmul.f32 1.442695, %v589_v48  ;;  %v686_v53 = vsel %vm581_vm11, %v1971_v49, 0.0 }
 0x3ad   :  { %1603 = vpow2.f32 %v652_v50  ;;  %687 = vadd.xlane.f32.xlu1 %v686_v53  ;;  %v626_v54 = vsel %vm581_vm11, %v1602_v52, 0.0 }
 0x3ae   :  { %1605 = vpow2.f32 %v654_v51  ;;  %627 = vadd.xlane.f32.xlu2 %v626_v54 }
 0x3af   :  { %1607 = vpow2.f32 %v592_v46 }
 0x3b0   :  { %v584_v55 = vpop.xlane.xlu1 %583  ;;  %v679_v56 = vpop.xlane.xlu2 %678 }
 0x3b1   :  { %v588_v57 = vsub.f32 %v579_v25, %v584_v55  ;;  %v681_v58 = vsub.f32 %v673_v27, %v679_v56  ;;  %v1518_v55 = vld [vmem:[#allocation8 + $0x8] sm:$0xff]  ;;  %v1517_v56 = vld [vmem:[#allocation8] sm:$0xff] }
 0x3b2   :  { %788 = vmatpush.bf16.msra.mxu1 %v1518_v55  ;;  %v1397_v55 = vld [vmem:[#allocation7 + $0x68] sm:$0xf0] }
 0x3b3   :  { %v1604_v59 = vpop.eup %1603  ;;  %v590_v60 = vmul.f32 1.442695, %v588_v57  ;;  %v684_v61 = vmul.f32 1.442695, %v681_v58 }
 0x3b4   :  { %v1606_v62 = vpop.eup %1605  ;;  %v656_v63 = vsel %vm581_vm11, %v1604_v59, 0.0 }
 0x3b5   :  { %v1608_v1 = vpop.eup %1607  ;;  %1609 = vpow2.f32 %v590_v60  ;;  %v659_v3 = vsel %vm581_vm11, %v1606_v62, 0.0  ;;  %657 = vadd.xlane.f32.xlu0 %v656_v63 }
 0x3b6   :  { %1611 = vpow2.f32 %v684_v61  ;;  %660 = vadd.xlane.f32.xlu2 %v659_v3  ;;  %v597_v4 = vsel %vm581_vm11, %v1608_v1, 0.0  ;;  %789 = vmatpush.bf16.msra.mxu1 %v1517_v56 }
 0x3b7   :  { %598 = vadd.xlane.f32.xlu1 %v597_v4 }
 0x3bb   :  { %v1610_v5 = vpop.eup %1609 }
 0x3bc   :  { %v1612_v6 = vpop.eup %1611  ;;  %v594_v7 = vsel %vm581_vm11, %v1610_v5, 0.0 }
 0x3bd   :  { %v689_v8 = vsel %vm581_vm11, %v1612_v6, 0.0 }
 0x3be   :  { %595 = vadd.xlane.f32.xlu2 %v594_v7  ;;  %690 = vadd.xlane.f32.xlu0 %v689_v8  ;;  %v1535_v7 = vld [vmem:[#allocation7 + $0xcc] sm:$0xf0]  ;;  %v1533_v8 = vld [vmem:[#allocation7 + $0xb8] sm:$0xf] }
 0x410   :  { %v631_v9 = vpop.xlane.xlu1 %630 }
 0x411   :  { %1613 = vrcp.f32 %v631_v9 }
 0x417   :  { %v1614_v11 = vpop.eup %1613 }
 0x418   :  { %v635_v16 = vmul.f32 %v1614_v11, %v1598_v33  ;;  %v1427_v11 = vld [vmem:[#allocation7 + $0xbc] sm:$0xf] }
 0x420   :  { %v688_v18 = vpop.xlane.xlu1 %687 }
 0x421   :  { %v628_v10 = vpop.xlane.xlu2 %627 }
 0x422   :  { %1615 = vrcp.f32 %v628_v10  ;;  %v1421_v10 = vld [vmem:[#allocation7 + $0xd0] sm:$0xf0] }
 0x428   :  { %v1616_v12 = vpop.eup %1615  ;;  %v658_v13 = vpop.xlane.xlu0 %657 }
 0x429   :  { %v661_v14 = vpop.xlane.xlu2 %660  ;;  %1617 = vrcp.f32 %v658_v13  ;;  %v634_v15 = vmul.f32 %v1616_v12, %v1602_v52  ;;  %v1536_v12 = vld [vmem:[#allocation7 + $0xd4] sm:$0xf0]  ;;  %v1424_v13 = vor.u32 %v1533_v8, %v1421_v10  ;;  %v1550_v10 = vld [vmem:[#allocation8 + $0x68] sm:$0xff] }
 0x42a   :  { %1619 = vrcp.f32 %v661_v14  ;;  %v599_v32 = vpop.xlane.xlu1 %598  ;;  %v1428_v14 = vor.u32 %v1536_v12, %v1427_v11  ;;  %v1540_v12 = vld [vmem:[#allocation8 + $0x18] sm:$0xff] }
 0x42b   :  { %v1576_v17 = vpack.i.bf16 %v635_v16, %v634_v15  ;;  %1621 = vrcp.f32 %v688_v18  ;;  %950 = vmatpush.bf16.msrb.mxu0 %v1424_v13  ;;  %v1531_v15 = vld [vmem:[#allocation7 + $0x94] sm:$0xf0]  ;;  %v1529_v16 = vld [vmem:[#allocation7 + $0x80] sm:$0xf]  ;;  %v1405_v18 = vld [vmem:[#allocation7 + $0x98] sm:$0xf0] }
 0x42c   :  { %964 = vmatpush.bf16.msrb.mxu1 %v1428_v14 }
 0x42d   :  { %1577 = vrot.lane.b32.xlu0 %v1576_v17, %s1791_s14 }
 0x42f   :  { %v1618_v19 = vpop.eup %1617 }
 0x430   :  { %v1620_v20 = vpop.eup %1619  ;;  %v664_v21 = vmul.f32 %v1618_v19, %v1604_v59  ;;  %v1411_v19 = vld [vmem:[#allocation7 + $0x84] sm:$0xf] }
 0x431   :  { %v691_v22 = vpop.xlane.xlu0 %690  ;;  %v665_v23 = vmul.f32 %v1620_v20, %v1606_v62  ;;  %v1622_v25 = vpop.eup %1621  ;;  %v1532_v20 = vld [vmem:[#allocation7 + $0x9c] sm:$0xf0] }
 0x432   :  { %1623 = vrcp.f32 %v691_v22  ;;  %v694_v27 = vmul.f32 %v1622_v25, %v1971_v49  ;;  %v596_v33 = vpop.xlane.xlu2 %595  ;;  %v1412_v22 = vor.u32 %v1532_v20, %v1411_v19  ;;  %v1527_v25 = vld [vmem:[#allocation7 + $0x5c] sm:$0xf0] }
 0x433   :  { %v1581_v24 = vpack.i.bf16 %v665_v23, %v664_v21  ;;  %1625 = vrcp.f32 %v599_v32  ;;  %v1408_v21 = vor.u32 %v1529_v16, %v1405_v18  ;;  %v1543_v23 = vld [vmem:[#allocation8 + $0x30] sm:$0xff]  ;;  %v1549_v20 = vld [vmem:[#allocation8 + $0x60] sm:$0xff] }
 0x434   :  { %1627 = vrcp.f32 %v596_v33  ;;  %965 = vmatpush.bf16.msrb.mxu1 %v1412_v22  ;;  %v1371_v33 = vld [vmem:[#allocation7 + $0xc] sm:$0xf]  ;;  %v1547_v16 = vld [vmem:[#allocation8 + $0x50] sm:$0xff] }
 0x435   :  { %1582 = vrot.lane.b32.xlu2 %v1581_v24, %s1792_s15  ;;  %951 = vmatpush.bf16.msrb.mxu0 %v1408_v21  ;;  %v1387_v24 = vld [vmem:[#allocation7 + $0x44] sm:$0xf] }
 0x438   :  { %v1624_v26 = vpop.eup %1623 }
 0x439   :  { %v695_v28 = vmul.f32 %v1624_v26, %v1612_v6  ;;  %v1626_v36 = vpop.eup %1625  ;;  %v1544_v6 = vld [vmem:[#allocation8 + $0x38] sm:$0xff]  ;;  %v1525_v26 = vld [vmem:[#allocation7 + $0x48] sm:$0xf] }
 0x43a   :  { %v1628_v37 = vpop.eup %1627  ;;  %v603_v40 = vmul.f32 %v1626_v36, %v1608_v1  ;;  %v1521_v36 = vld [vmem:[#allocation7 + $0x10] sm:$0xf] }
 0x43b   :  { %v1586_v29 = vpack.i.bf16 %v695_v28, %v694_v27  ;;  %v602_v41 = vmul.f32 %v1628_v37, %v1610_v5  ;;  %v1388_v27 = vor.u32 %v1527_v25, %v1387_v24  ;;  %v1389_v28 = vld [vmem:[#allocation7 + $0x60] sm:$0xf0]  ;;  %v1538_v24 = vld [vmem:[#allocation8 + $0x8] sm:$0xff] }
 0x43c   :  { %v1392_v31 = vor.u32 %v1525_v26, %v1389_v28  ;;  %v1545_v25 = vld [vmem:[#allocation8 + $0x40] sm:$0xff]  ;;  %v1548_v26 = vld [vmem:[#allocation8 + $0x58] sm:$0xff] }
 0x43d   :  { %1587 = vrot.lane.b32.xlu1 %v1586_v29, %s1793_s16  ;;  %v1395_v29 = vld [vmem:[#allocation7 + $0x4c] sm:$0xf]  ;;  %v1537_v28 = vld [vmem:[#allocation8] sm:$0xff] }
 0x43e   :  { %v1396_v32 = vor.u32 %v1528_v30, %v1395_v29  ;;  %952 = vmatpush.bf16.msrb.mxu0 %v1392_v31 }
 0x440   :  { %966 = vmatpush.bf16.msrb.mxu1 %v1396_v32 }
 0x445   :  { %1200 = vrot.lane.b32.xlu1 %v1544_v6, %s1785_s2  ;;  %v1551_v6 = vld [vmem:[#allocation8 + $0x70] sm:$0xff] }
 0x44d   :  { %1198 = vrot.lane.b32.xlu1 %v1543_v23, %s1785_s2 }
 0x48f   :  { %v1583_v42 = vpop.permute.xlu2 %1582 }
 0x490   :  { %v1585_v45 = vunpack.i.h.bf16 %v1583_v42  ;;  %v1584_v47 = vunpack.i.l.bf16 %v1583_v42 }
 0x49f   :  { %v1578_v34 = vpop.permute.xlu0 %1577 }
 0x4a0   :  { %v1580_v38 = vunpack.i.h.bf16 %v1578_v34  ;;  %v1579_v39 = vunpack.i.l.bf16 %v1578_v34  ;;  %v1523_v34 = vld [vmem:[#allocation7 + $0x24] sm:$0xf0] }
 0x4a1   :  { %v1372_v37 = vor.u32 %v1523_v34, %v1371_v33 }
 0x4a2   :  { %v721_v43 = vsel %vm581_vm11, %v603_v40, %v1580_v38  ;;  %v720_v44 = vsel %vm581_vm11, %v602_v41, %v1579_v39  ;;  %v1373_v38 = vld [vmem:[#allocation7 + $0x28] sm:$0xf0]  ;;  %v1379_v39 = vld [vmem:[#allocation7 + $0x14] sm:$0xf]  ;;  %v1524_v40 = vld [vmem:[#allocation7 + $0x2c] sm:$0xf0] }
 0x4a3   :  { %v723_v51 = vsel %vm722_vm15, %v720_v44, %v1584_v47  ;;  %v724_v52 = vsel %vm722_vm15, %v721_v43, %v1585_v45  ;;  %v1376_v41 = vor.u32 %v1521_v36, %v1373_v38  ;;  %v1380_v42 = vor.u32 %v1524_v40, %v1379_v39  ;;  %v1552_v43 = vld [vmem:[#allocation8 + $0x78] sm:$0xff]  ;;  %v1534_v47 = vld [vmem:[#allocation7 + $0xc0] sm:$0xf] }
 0x4a4   :  { %1216 = vrot.lane.b32.xlu1 %v1552_v43, %s1785_s2 }
 0x4a5   :  { %953 = vmatpush.bf16.msrb.mxu0 %v1376_v41  ;;  %967 = vmatpush.bf16.msrb.mxu1 %v1380_v42 }
 0x4af   :  { %v1588_v48 = vpop.permute.xlu1 %1587 }
 0x4b0   :  { %v1590_v49 = vunpack.i.h.bf16 %v1588_v48  ;;  %v1589_v50 = vunpack.i.l.bf16 %v1588_v48  ;;  %v1429_v48 = vld [vmem:[#allocation7 + $0xd8] sm:$0xf0] }
 0x4b2   :  { %v726_v46 = vsel %vm725_vm1, %v723_v51, %v1589_v50  ;;  %v727_v53 = vsel %vm725_vm1, %v724_v52, %v1590_v49  ;;  %v1432_v50 = vor.u32 %v1534_v47, %v1429_v48  ;;  %v1530_v51 = vld [vmem:[#allocation7 + $0x88] sm:$0xf]  ;;  %v1413_v52 = vld [vmem:[#allocation7 + $0xa0] sm:$0xf0] }
 0x4b3   :  { %v728_v54 = vpack.c.bf16 %v727_v53, %v726_v46  ;;  %v1416_v46 = vor.u32 %v1530_v51, %v1413_v52  ;;  %v1542_v53 = vld [vmem:[#allocation8 + $0x28] sm:$0xff] }
 0x4b4   :  { %1196 = vrot.lane.b32.xlu1 %v1542_v53, %s1785_s2 }
 0x4b5   :  { %1351 = vmatmul.msk.bf16.vlgmr.msra.gmra.mxu0 %vm86_vm0, %v728_v54  ;;  %v1526_v54 = vld [vmem:[#allocation7 + $0x50] sm:$0xf] }
 0x4b7   :  { %v1201_v29 = vpop.permute.xlu1 %1200 }
 0x4b8   :  { %1234 = vmatpush.bf16.msrb.mxu3 %v1201_v29 }
 0x4bc   :  { %1214 = vrot.lane.b32.xlu1 %v1551_v6, %s1785_s2 }
 0x4bf   :  { %v1199_v30 = vpop.permute.xlu1 %1198 }
 0x4c0   :  { %1235 = vmatpush.bf16.msrb.mxu3 %v1199_v30 }
 0x4c4   :  { %1192 = vrot.lane.b32.xlu1 %v1540_v12, %s1785_s2 }
 0x4cc   :  { %1210 = vrot.lane.b32.xlu1 %v1549_v20, %s1785_s2 }
 0x4d4   :  { %1208 = vrot.lane.b32.xlu1 %v1548_v26, %s1785_s2 }
 0x4dc   :  { %1186 = vrot.lane.b32.xlu1 %v1537_v28, %s1785_s2 }
 0x516   :  { %v1217_v31 = vpop.permute.xlu1 %1216 }
 0x517   :  { %1248 = vmatpush.bf16.msra.mxu0 %v1217_v31 }
 0x526   :  { %v1197_v32 = vpop.permute.xlu1 %1196 }
 0x527   :  { %1236 = vmatpush.bf16.msrb.mxu3 %v1197_v32 }
 0x52e   :  { %v1215_v33 = vpop.permute.xlu1 %1214 }
 0x52f   :  { %1249 = vmatpush.bf16.msra.mxu0 %v1215_v33 }
 0x532   :  { %v741_v57 = vpop.f32.mrf.mxu0 }
 0x536   :  { %v1193_v34 = vpop.permute.xlu1 %1192 }
 0x53a   :  { %v743_v58 = vpop.f32.mrf.mxu0 }
 0x53b   :  { %v746_v59 = vpack.c.bf16 %v743_v58, %v741_v57  ;;  %v1400_v58 = vor.u32 %v1526_v54, %v1397_v55 }
 0x53d   :  { %1368 = vmatmul.msk.bf16.vlgmr.msra.gmra.mxu1 %vm86_vm0, %v746_v59  ;;  %v1522_v59 = vld [vmem:[#allocation7 + $0x18] sm:$0xf] }
 0x5ba   :  { %v791_v60 = vpop.f32.mrf.mxu1 }
 0x5bb   :  { %v1987_v61 = vadd.f32 %v791_v60, %v1840_v0  ;;  %v1419_v0 = vld [vmem:[#allocation7 + $0xb4] sm:$0xf] }
 0x5bc   :  { %v1420_v9 = vor.u32 %v1535_v7, %v1419_v0  ;;  %v1381_v60 = vld [vmem:[#allocation7 + $0x30] sm:$0xf0] }
 0x5bd   :  { %v798_v62 = vmul.f32 %v1987_v61, %v1987_v61 }
 0x5be   :  { %936 = vmatpush.bf16.msrb.mxu2 %v1420_v9 }
 0x5bf   :  { %v800_v63 = vsel %vm86_vm0, %v798_v62, 0.0 }
 0x5c0   :  { %801 = vadd.xlane.f32.xlu0 %v800_v63 }
 0x5c2   :  { %v793_v1 = vpop.f32.mrf.mxu1 }
 0x5c3   :  { %v1993_v3 = vadd.f32 %v793_v1, %v1844_v2  ;;  %v1403_v2 = vld [vmem:[#allocation7 + $0x7c] sm:$0xf] }
 0x5c4   :  { %v1404_v17 = vor.u32 %v1531_v15, %v1403_v2  ;;  %v1539_v2 = vld [vmem:[#allocation8 + $0x10] sm:$0xff] }
 0x5c5   :  { %v799_v4 = vmul.f32 %v1993_v3, %v1993_v3 }
 0x5c6   :  { %937 = vmatpush.bf16.msrb.mxu2 %v1404_v17 }
 0x5c7   :  { %v803_v5 = vsel %vm86_vm0, %v799_v4, 0.0  ;;  %v1384_v4 = vor.u32 %v1522_v59, %v1381_v60 }
 0x5c8   :  { %804 = vadd.xlane.f32.xlu2 %v803_v5 }
 0x5ca   :  { %938 = vmatpush.bf16.msrb.mxu2 %v1388_v27  ;;  %v1546_v27 = vld [vmem:[#allocation8 + $0x48] sm:$0xff] }
 0x5ce   :  { %939 = vmatpush.bf16.msrb.mxu2 %v1372_v37  ;;  %v1211_v37 = vpop.permute.xlu1 %1210 }
 0x5d2   :  { %978 = vmatpush.bf16.msra.mxu2 %v1432_v50 }
 0x5d6   :  { %979 = vmatpush.bf16.msra.mxu2 %v1416_v46  ;;  %v1209_v40 = vpop.permute.xlu1 %1208 }
 0x5da   :  { %980 = vmatpush.bf16.msra.mxu2 %v1400_v58 }
 0x5de   :  { %981 = vmatpush.bf16.msra.mxu2 %v1384_v4  ;;  %v1187_v53 = vpop.permute.xlu1 %1186 }
 0x5e0   :  { %1212 = vrot.lane.b32.xlu2 %v1550_v10, %s1785_s2 }
 0x5e8   :  { %1206 = vrot.lane.b32.xlu2 %v1547_v16, %s1785_s2 }
 0x5f0   :  { %1202 = vrot.lane.b32.xlu2 %v1545_v25, %s1785_s2 }
 0x633   :  { %v802_v44 = vpop.xlane.xlu0 %801 }
 0x634   :  { %v806_v45 = vmul.f32 %v802_v44, %v1850_v35 }
 0x636   :  { %v808_v49 = vadd.f32 1e-05, %v806_v45 }
 0x638   :  { %1629 = vrsqrt.f32 %v808_v49  ;;  %vm816_vm3 = vweird.f32 %v808_v49 }
 0x63b   :  { %v805_v56 = vpop.xlane.xlu2 %804 }
 0x63c   :  { %v807_v57 = vmul.f32 %v805_v56, %v1850_v35  ;;  %v1541_v35 = vld [vmem:[#allocation8 + $0x20] sm:$0xff] }
 0x63d   :  { %1194 = vrot.lane.b32.xlu0 %v1541_v35, %s1785_s2 }
 0x63e   :  { %v1630_v62 = vpop.eup %1629  ;;  %v809_v63 = vadd.f32 1e-05, %v807_v57 }
 0x63f   :  { %v811_v1 = vmul.f32 %v1630_v62, %v808_v49  ;;  %vm817_vm2 = vweird.f32 %v1630_v62 }
 0x640   :  { %1631 = vrsqrt.f32 %v809_v63  ;;  %vm818_vm5 = vmor %vm816_vm3, %vm817_vm2  ;;  %vm826_vm6 = vweird.f32 %v809_v63 }
 0x641   :  { %v812_v5 = vmul.f32 %v1630_v62, %v811_v1 }
 0x643   :  { %v813_v0 = vmul.f32 0.5, %v812_v5  ;;  %v1213_v39 = vpop.permute.xlu2 %1212 }
 0x644   :  { %1250 = vmatpush.bf16.msra.mxu0 %v1213_v39 }
 0x645   :  { %v814_v8 = vsub.f32 1.5, %v813_v0  ;;  %1190 = vrot.lane.b32.xlu0 %v1539_v2, %s1785_s2 }
 0x646   :  { %v1632_v7 = vpop.eup %1631 }
 0x647   :  { %v821_v9 = vmul.f32 %v1632_v7, %v809_v63  ;;  %v815_v13 = vmul.f32 %v1630_v62, %v814_v8  ;;  %vm827_vm4 = vweird.f32 %v1632_v7 }
 0x648   :  { %vm828_vm7 = vmor %vm826_vm6, %vm827_vm4  ;;  %1251 = vmatpush.bf16.msra.mxu0 %v1211_v37 }
 0x649   :  { %v822_v11 = vmul.f32 %v1632_v7, %v821_v9  ;;  %v819_v17 = vsel %vm818_vm5, %v1630_v62, %v815_v13 }
 0x64a   :  { %v830_v21 = vmul.f32 %v819_v17, %v1987_v61 }
 0x64b   :  { %v823_v14 = vmul.f32 0.5, %v822_v11  ;;  %v1207_v44 = vpop.permute.xlu2 %1206 }
 0x64c   :  { %1252 = vmatpush.bf16.msra.mxu0 %v1209_v40 }
 0x64d   :  { %v824_v15 = vsub.f32 1.5, %v823_v14  ;;  %1188 = vrot.lane.b32.xlu0 %v1538_v24, %s1785_s2 }
 0x64f   :  { %v825_v18 = vmul.f32 %v1632_v7, %v824_v15 }
 0x650   :  { %1253 = vmatpush.bf16.msra.mxu0 %v1207_v44 }
 0x651   :  { %v829_v19 = vsel %vm828_vm7, %v1632_v7, %v825_v18 }
 0x652   :  { %v831_v22 = vmul.f32 %v829_v19, %v1993_v3 }
 0x653   :  { %v1203_v52 = vpop.permute.xlu2 %1202 }
 0x654   :  { %v832_v23 = vpack.c.bf16 %v831_v22, %v830_v21 }
 0x655   :  { %1204 = vrot.lane.b32.xlu0 %v1546_v27, %s1785_s2 }
 0x656   :  { %1433 = vmatmul.msk.bf16.vlgmr.msrb.gmra.mxu2 %vm86_vm0, %v832_v23  ;;  %1434 = vmatmul.msk.bf16.vlgmr.msrb.gmra.mxu0 %vm86_vm0, %v832_v23 }
 0x657   :  { %1435 = vmatmul.msk.bf16.vlgmr.msrb.gmra.mxu1 %vm86_vm0, %v832_v23 }
 0x666   :  { %1436 = vmatmul.msk.bf16.vlgmr.msra.gmra.mxu2 %vm86_vm0, %v832_v23 }
 0x6af   :  { %v1195_v36 = vpop.permute.xlu0 %1194 }
 0x6b0   :  { %1237 = vmatpush.bf16.msrb.mxu3 %v1195_v36 }
 0x6b4   :  { %1238 = vmatpush.bf16.msrb.mxu3 %v1193_v34 }
 0x6b7   :  { %v1191_v38 = vpop.permute.xlu0 %1190 }
 0x6b8   :  { %1239 = vmatpush.bf16.msrb.mxu3 %v1191_v38 }
 0x6bf   :  { %v1189_v41 = vpop.permute.xlu0 %1188 }
 0x6c0   :  { %1240 = vmatpush.bf16.msrb.mxu3 %v1189_v41 }
 0x6c4   :  { %1241 = vmatpush.bf16.msrb.mxu3 %v1187_v53 }
 0x6c7   :  { %v1205_v45 = vpop.permute.xlu0 %1204 }
 0x6c8   :  { %1254 = vmatpush.bf16.msra.mxu0 %v1205_v45 }
 0x6cc   :  { %1255 = vmatpush.bf16.msra.mxu0 %v1203_v52 }
 0x6d3   :  { %v2022_v42 = vpop.f32.mrf.mxu0 }
 0x6d4   :  { %v1438_v43 = vmul.f32 -1.442695, %v2022_v42  ;;  %v969_v26 = vpop.f32.mrf.mxu1 }
 0x6d6   :  { %1633 = vpow2.f32 %v1438_v43 }
 0x6d9   :  { %v2025_v47 = vpop.f32.mrf.mxu2 }
 0x6da   :  { %v1437_v48 = vmul.f32 -1.442695, %v2025_v47 }
 0x6db   :  { %v2028_v49 = vpop.f32.mrf.mxu0 }
 0x6dc   :  { %v1634_v50 = vpop.eup %1633  ;;  %1635 = vpow2.f32 %v1437_v48  ;;  %v1440_v51 = vmul.f32 -1.442695, %v2028_v49 }
 0x6dd   :  { %v1001_v46 = vadd.f32 1.0, %v1634_v50 }
 0x6de   :  { %1637 = vpow2.f32 %v1440_v51 }
 0x6df   :  { %1639 = vrcp.f32 %v1001_v46  ;;  %v1030_v35 = vand.u32 2147483648, %v1001_v46  ;;  %vm1024_vm9 = vweird.f32 %v1001_v46  ;;  %v1028_v10 = vand.u32 2147483647, %v1001_v46 }
 0x6e1   :  { %v2031_v54 = vpop.f32.mrf.mxu2  ;;  %v1031_v15 = vor.u32 1.1754944e-38, %v1030_v35  ;;  %vm1029_vm12 = vcmp.eq.f32.partialorder %v1028_v10, 8.507059e+37 }
 0x6e2   :  { %v1636_v55 = vpop.eup %1635  ;;  %v1439_v56 = vmul.f32 -1.442695, %v2031_v54 }
 0x6e3   :  { %v1000_v57 = vadd.f32 1.0, %v1636_v55 }
 0x6e4   :  { %v1638_v58 = vpop.eup %1637  ;;  %1641 = vpow2.f32 %v1439_v56  ;;  %v971_v56 = vpop.f32.mrf.mxu1 }
 0x6e5   :  { %v1640_v59 = vpop.eup %1639  ;;  %1643 = vrcp.f32 %v1000_v57  ;;  %v1003_v62 = vadd.f32 1.0, %v1638_v58  ;;  %v1013_v16 = vand.u32 2147483647, %v1000_v57  ;;  %v1015_v19 = vand.u32 2147483648, %v1000_v57 }
 0x6e6   :  { %v1020_v60 = vmul.f32 %v1640_v59, %v1001_v46  ;;  %vm1025_vm8 = vweird.f32 %v1640_v59  ;;  %vm1009_vm14 = vweird.f32 %v1000_v57 }
 0x6e7   :  { %1645 = vrcp.f32 %v1003_v62  ;;  %vm2034_vm10 = vmor %vm1024_vm9, %vm1025_vm8  ;;  %v1060_v20 = vand.u32 2147483648, %v1003_v62  ;;  %v1058_v23 = vand.u32 2147483647, %v1003_v62  ;;  %vm2044_vm1 = vcmp.eq.f32.partialorder %v1013_v16, 8.507059e+37 }
 0x6e8   :  { %v1021_v63 = vsub.f32 1.0, %v1020_v60  ;;  %vm1054_vm2 = vweird.f32 %v1003_v62  ;;  %v1016_v31 = vor.u32 1.1754944e-38, %v1015_v19 }
 0x6e9   :  { %v983_v14 = vpop.f32.mrf.mxu2  ;;  %v1061_v32 = vor.u32 1.1754944e-38, %v1060_v20  ;;  %vm1059_vm4 = vcmp.eq.f32.partialorder %v1058_v23, 8.507059e+37 }
 0x6ea   :  { %v1642_v1 = vpop.eup %1641  ;;  %v1022_v4 = vmul.f32 %v1640_v59, %v1021_v63 }
 0x6eb   :  { %v1644_v5 = vpop.eup %1643  ;;  %v1002_v6 = vadd.f32 1.0, %v1642_v1 }
 0x6ec   :  { %v1005_v0 = vmul.f32 %v1644_v5, %v1000_v57  ;;  %v1023_v7 = vadd.f32 %v1640_v59, %v1022_v4  ;;  %vm1010_vm11 = vweird.f32 %v1644_v5 }
 0x6ed   :  { %1647 = vrcp.f32 %v1002_v6  ;;  %v1646_v8 = vpop.eup %1645  ;;  %vm2040_vm15 = vmor %vm1009_vm14, %vm1010_vm11  ;;  %v1045_v37 = vand.u32 2147483648, %v1002_v6  ;;  %v1043_v40 = vand.u32 2147483647, %v1002_v6  ;;  %vm1039_vm6 = vweird.f32 %v1002_v6 }
 0x6ee   :  { %v1006_v9 = vsub.f32 1.0, %v1005_v0  ;;  %v1050_v11 = vmul.f32 %v1646_v8, %v1003_v62  ;;  %v1027_v2 = vsel %vm2034_vm10, %v1640_v59, %v1023_v7  ;;  %vm1055_vm13 = vweird.f32 %v1646_v8 }
 0x6ef   :  { %v1032_v24 = vsel %vm1029_vm12, %v1031_v15, %v1027_v2  ;;  %vm1056_vm3 = vmor %vm1054_vm2, %vm1055_vm13  ;;  %v1046_v48 = vor.u32 1.1754944e-38, %v1045_v37  ;;  %vm1044_vm8 = vcmp.eq.f32.partialorder %v1043_v40, 8.507059e+37 }
 0x6f0   :  { %v1007_v13 = vmul.f32 %v1644_v5, %v1006_v9  ;;  %v1051_v17 = vsub.f32 1.0, %v1050_v11  ;;  %v1065_v34 = vmul.f32 %v1032_v24, %v2022_v42 }
 0x6f1   :  { %v985_v45 = vpop.f32.mrf.mxu2 }
 0x6f2   :  { %v1008_v18 = vadd.f32 %v1644_v5, %v1007_v13  ;;  %v1052_v22 = vmul.f32 %v1646_v8, %v1051_v17  ;;  %v1069_v50 = vmul.f32 %v1065_v34, %v983_v14 }
 0x6f3   :  { %v1648_v21 = vpop.eup %1647 }
 0x6f4   :  { %v1035_v25 = vmul.f32 %v1648_v21, %v1002_v6  ;;  %v1053_v29 = vadd.f32 %v1646_v8, %v1052_v22  ;;  %v1012_v30 = vsel %vm2040_vm15, %v1644_v5, %v1008_v18  ;;  %vm1040_vm5 = vweird.f32 %v1648_v21 }
 0x6f5   :  { %v1017_v41 = vsel %vm2044_vm1, %v1016_v31, %v1012_v30  ;;  %vm1041_vm7 = vmor %vm1039_vm6, %vm1040_vm5 }
 0x6f6   :  { %v1036_v33 = vsub.f32 1.0, %v1035_v25  ;;  %v1057_v36 = vsel %vm1056_vm3, %v1646_v8, %v1053_v29  ;;  %v1064_v42 = vmul.f32 %v1017_v41, %v2025_v47 }
 0x6f7   :  { %v1062_v38 = vsel %vm1059_vm4, %v1061_v32, %v1057_v36 }
 0x6f8   :  { %v1037_v39 = vmul.f32 %v1648_v21, %v1036_v33  ;;  %v1067_v43 = vmul.f32 %v1062_v38, %v2028_v49  ;;  %v1068_v57 = vmul.f32 %v1064_v42, %v969_v26 }
 0x6fa   :  { %v1038_v44 = vadd.f32 %v1648_v21, %v1037_v39  ;;  %v1071_v51 = vmul.f32 %v1067_v43, %v985_v45 }
 0x6fc   :  { %v1042_v52 = vsel %vm1041_vm7, %v1648_v21, %v1038_v44  ;;  %v1073_v53 = vpack.c.bf16 %v1071_v51, %v1069_v50 }
 0x6fd   :  { %v1047_v46 = vsel %vm1044_vm8, %v1046_v48, %v1042_v52 }
 0x6fe   :  { %v1066_v55 = vmul.f32 %v1047_v46, %v2031_v54  ;;  %1256 = vmatmul.bf16.vlgmr.msra.gmra.mxu0 %v1073_v53 }
 0x700   :  { %v1070_v58 = vmul.f32 %v1066_v55, %v971_v56 }
 0x702   :  { %v1072_v49 = vpack.c.bf16 %v1070_v58, %v1068_v57 }
 0x704   :  { %1242 = vmatmul.bf16.vlgmr.msrb.gmra.mxu3 %v1072_v49 }
 0x77b   :  { %v1257_v59 = vpop.f32.mrf.mxu0 }
 0x783   :  { %v1259_v47 = vpop.f32.mrf.mxu0 }
 0x787   :  { %v1243_v60 = vpop.f32.mrf.mxu3 }
 0x788   :  { %v1258_v62 = vadd.f32 %v1257_v59, %v1243_v60 }
 0x78a   :  { %v1262_v63 = vadd.f32 %v1258_v62, %v1987_v61 }
 0x78c   :  { %1264 = vst.msk [vmem:[#allocation10] sm:$0xff] %vm86_vm0, %v1262_v63 }
 0x78f   :  { %v1245_v1 = vpop.f32.mrf.mxu3 }
 0x790   :  { %v1260_v54 = vadd.f32 %v1259_v47, %v1245_v1 }
 0x792   :  { %v1263_v4 = vadd.f32 %v1260_v54, %v1993_v3 }
 0x794   :  { %1265 = vst.msk [vmem:[#allocation10 + $0x8] sm:$0xff] %vm86_vm0, %v1263_v4 }
 0x795   :  { %1278 = dma.vmem_to_hbm [thread:$0]  %s1271_s18, 256, %s1273_s21, [#allocation4], %s1778_s23, %s1778_s23, %s1779_s24  }
 0x796   :  { %1775 = dma.done.wait [#allocation4], 256  }
 0x797   :  { %1776 = vsyncadd [#allocation4], 4294967040 }
 0x798   :  { %1283 = vsyncpa [#allocation3], 1 }
 0x799   :  { %1284 = vsyncpa [#allocation6], 1 }
 0x79a   :  { %1285 = vsyncpa [#allocation9], 1 }
 0x79b   :  { %1286 = vsyncpa [#allocation4], 1 }

</bundles_post_ra>
